<compile_context>
chip_gen: v7x
topology: tpu7x:2x2x1
jax: 0.10.0
libtpu: 0.0.40
codegen_flags: <defaults>
</compile_context>

<pallas_src>
import functools

import numpy as np
import jax
import jax.numpy as jnp
from jax.experimental import pallas as pl
from jax.experimental.pallas import tpu as pltpu

# Model hyperparameters (default AugmentedGalerkin config)
IN_FEATURES = 1            # bmm in WeightAdaptiveGallinear only works for in_features == 1
OUT_FEATURES = 16
LATENT_DIM = 3
HIDDEN_DIM = 32
N_EIG = 2
HAR_MODE = 4               # -> n_range = [0,1,1,1,1,2], n_harmonics = 6
N_HARMONICS = 6
TWO_H = N_EIG * N_HARMONICS                                     # 12
K = (IN_FEATURES + 1) * OUT_FEATURES                            # 32
COEFFS_SIZE = K * TWO_H                                         # 384 = 3 * 128
BATCH = 8

assert COEFFS_SIZE == 3 * 128 and 128 // K == 4                 # roll-reduction assumes this

# TODO(synk): merger=True (coeff_distributer Linear), alw=True (element-wise 2x4
# dilation/shift basis) and the debug print/self.flag side-effects are not
# implemented (not exercised by the default config).

# ---- static tables (module-level numpy; constant-folded under jit) -------------
_N_RANGE = np.array([0.0, 1.0, 1.0, 1.0, 1.0, 2.0], np.float32)        # har_mode=4
# harmonic-major column layout: new column j*K + k  <->  coeffs[b, k, j]
_PERM = np.arange(COEFFS_SIZE).reshape(K, TWO_H).T.reshape(-1)          # new -> old
_N_FULL = np.repeat(np.concatenate([_N_RANGE, _N_RANGE]), K).reshape(1, COEFFS_SIZE)
_PHASE = np.repeat(
    np.concatenate([np.zeros(N_HARMONICS, np.float32),
                    np.full(N_HARMONICS, np.pi / 2, np.float32)]),
    K).reshape(1, COEFFS_SIZE).astype(np.float32)
# cos(s*n - phase) == cos(s*n) for the first N_HARMONICS groups, sin(s*n) after.


def augmented_galerkin_kernel(xz_ref, trig_ref, w1_ref, b1_ref, w2_ref, b2_ref, o_ref):
    B, T_BLK, F = xz_ref.shape                       # (B, T_BLK, 1 + LATENT_DIM)
    R = B * T_BLK                                    # fused row count for the MXU

    xz3 = xz_ref[...]                                # (B, T_BLK, 4)
    # Leading-dim merge; T_BLK % 8 == 0 so this is a layout no-op.
    xz2 = xz3.reshape(R, F)                          # (R, 4) columns = [x, z0, z1, z2]

    # ---- CoeffDecoder fc1 + tanh: contraction depth is only LATENT_DIM=3, so do
    #      it as broadcast FMAs on the VPU over all fused rows. --------------------
    h = b1_ref[...]                                  # (1, HIDDEN)
    for j in range(LATENT_DIM):
        h = h + xz2[:, IN_FEATURES + j:IN_FEATURES + j + 1] * w1_ref[j:j + 1, :]
    h = jnp.tanh(h)                                  # (R, HIDDEN)

    # ---- CoeffDecoder fc2: one MXU matmul over all fused rows (f32 operands,
    #      f32 accumulation). W2/b2 are pre-permuted to harmonic-major layout. ----
    c = jnp.dot(h, w2_ref[...],
                preferred_element_type=jnp.float32) + b2_ref[...]       # (R, 384)

    # ---- Multiply by the precomputed Fourier basis.  The (T_BLK, 384) table
    #      broadcasts over the leading batch dim with no data movement. -----------
    c3 = c.reshape(B, T_BLK, COEFFS_SIZE)            # leading-dim split (no-op)
    prod = c3 * trig_ref[...]                        # (B, T_BLK, 384)

    # ---- Galerkin contraction over the 12 harmonic columns: three lane-aligned
    #      128-wide adds, then a roll-based log reduction down to lanes 0:K. ------
    p = prod[..., 0:128] + prod[..., 128:256] + prod[..., 256:384]      # (B, T_BLK, 128)
    p = p + pltpu.roll(p, 64, axis=2)
    p = p + pltpu.roll(p, 32, axis=2)                # lanes 0:K hold [weight | bias]

    x = xz3[..., 0:IN_FEATURES]                      # (B, T_BLK, 1)
    # squeeze(bmm(x[:, :, None], weight)) == x * weight for in_features == 1
    out = x * p[..., 0:OUT_FEATURES] + p[..., OUT_FEATURES:K]           # (B, T_BLK, 16)

    # ---- Lane-dense store: pack the B batch rows into the 128 output lanes
    #      (column layout b*16 + o; undone by a free reshape in the wrapper). -----
    for b in range(B):
        o_ref[:, b * OUT_FEATURES:(b + 1) * OUT_FEATURES] = out[b]


def prepare_params(params):
    """One-time parameter prep: permute fc2 columns to harmonic-major layout.
    Everything stays f32 (the kernel is overhead-bound, not MXU-bound)."""
    w1, b1, w2, b2 = params
    w2p = jnp.asarray(w2, jnp.float32)[:, _PERM]
    b2p = jnp.asarray(b2, jnp.float32)[:, _PERM]
    return (jnp.asarray(w1, jnp.float32), jnp.asarray(b1, jnp.float32), w2p, b2p)


def _default_num_blocks():
    """2 grid blocks on v7x (two TensorCores split the 'parallel' axis), 1 elsewhere."""
    try:
        kind = jax.devices()[0].device_kind.lower()
    except Exception:
        return 1
    return 2 if "7" in kind else 1


@functools.partial(jax.jit, static_argnums=(4,))
def augmented_galerkin_steps(x_steps, z_steps, s_steps, prepared, num_blocks):
    """Evaluate the AugmentedGalerkin forward for T stacked (x, z, s) evaluations
    with 1 (or 2 on v7x) fused grid blocks; weights stay resident in VMEM."""
    w1, b1, w2p, b2p = prepared
    T, B, _ = x_steps.shape
    G = max(int(num_blocks), 1)
    T_BLK = 8 * (-(-T // (8 * G)))                   # multiple of 8 per block
    Tp = G * T_BLK                                   # padded step count

    # Fuse x and z into one per-step input, batch-major so a grid block is one
    # contiguous (B, T_BLK, 4) slab; pad the step axis up to Tp.
    xz = jnp.concatenate([jnp.asarray(x_steps, jnp.float32),
                          jnp.asarray(z_steps, jnp.float32)], axis=-1)   # (T, B, 4)
    xz = jnp.transpose(xz, (1, 0, 2))                                    # (B, T, 4)
    xz = jnp.pad(xz, ((0, 0), (0, Tp - T), (0, 0)))

    # Precompute the phase-shifted-cosine Fourier basis per step in the wrapper.
    s = jnp.asarray(s_steps, jnp.float32).reshape(T, 1)
    trig = jnp.cos(s * jnp.asarray(_N_FULL) - jnp.asarray(_PHASE))       # (T, 384)
    trig = jnp.pad(trig, ((0, Tp - T), (0, 0)))

    const = lambda i: (0, 0)                          # resident weights/tables
    grid_spec = pltpu.PrefetchScalarGridSpec(
        num_scalar_prefetch=0,
        grid=(G,),
        in_specs=[
            pl.BlockSpec((B, T_BLK, IN_FEATURES + LATENT_DIM), lambda i: (0, i, 0)),
            pl.BlockSpec((T_BLK, COEFFS_SIZE), lambda i: (i, 0)),
            pl.BlockSpec((LATENT_DIM, HIDDEN_DIM), const),
            pl.BlockSpec((1, HIDDEN_DIM), const),
            pl.BlockSpec((HIDDEN_DIM, COEFFS_SIZE), const),
            pl.BlockSpec((1, COEFFS_SIZE), const),
        ],
        # Lane-dense output: (T_BLK, B*16) = (T_BLK, 128) per block.
        out_specs=pl.BlockSpec((T_BLK, B * OUT_FEATURES), lambda i: (i, 0)),
    )
    out_ld = pl.pallas_call(
        augmented_galerkin_kernel,
        out_shape=jax.ShapeDtypeStruct((Tp, B * OUT_FEATURES), jnp.float32),
        grid_spec=grid_spec,
        compiler_params=pltpu.CompilerParams(
            dimension_semantics=("parallel",)),       # disjoint output blocks -> safe
    )(xz, trig, w1, b1, w2p, b2p)

    # Undo the lane packing (free in XLA) and drop the step padding.
    return out_ld.reshape(Tp, B, OUT_FEATURES)[:T]


def reference(x, z, s, params):
    """Pure-JAX reference mirroring the PyTorch forward (aew=False path)."""
    w1, b1, w2, b2 = params
    h = jnp.tanh(z @ w1 + b1)
    c = h @ w2 + b2
    coeffs = c.reshape(x.shape[0], K, TWO_H)
    n_range = jnp.asarray(_N_RANGE)
    basis = jnp.concatenate([jnp.cos(s * n_range), jnp.sin(s * n_range)])  # (TWO_H,)
    w = (coeffs * basis[None, None, :]).sum(-1)                            # (B, K)
    weight = w[:, :OUT_FEATURES]
    bias = w[:, OUT_FEATURES:]
    return x * weight + bias


if __name__ == "__main__":
    key = jax.random.PRNGKey(0)
    k1, k2, k3, k4, k5, k6, k7 = jax.random.split(key, 7)

    # T stacked evaluations (e.g. solver steps / RK stages sharing the same params);
    # T is deliberately not a multiple of 8 to exercise the padding path.
    T = 10
    x_steps = jax.random.normal(k1, (T, BATCH, IN_FEATURES), jnp.float32)
    z_steps = jax.random.normal(k2, (T, BATCH, LATENT_DIM), jnp.float32)
    s_steps = jax.random.uniform(k7, (T,), jnp.float32)

    # Parameters (CoeffDecoder shapes), stored pre-transposed as (in, out).
    w1 = jax.random.normal(k3, (LATENT_DIM, HIDDEN_DIM), jnp.float32) / np.sqrt(LATENT_DIM)
    b1 = 0.1 * jax.random.normal(k4, (1, HIDDEN_DIM), jnp.float32)
    w2 = jax.random.normal(k5, (HIDDEN_DIM, COEFFS_SIZE), jnp.float32) / np.sqrt(HIDDEN_DIM)
    b2 = 0.1 * jax.random.normal(k6, (1, COEFFS_SIZE), jnp.float32)
    params = (w1, b1, w2, b2)

    ref = jnp.stack([reference(x_steps[t], z_steps[t], s_steps[t], params)
                     for t in range(T)])

    prepared = prepare_params(params)
    num_blocks = _default_num_blocks()
    out = jax.block_until_ready(
        augmented_galerkin_steps(x_steps, z_steps, s_steps, prepared, num_blocks))

    assert out.shape == (T, BATCH, OUT_FEATURES)
    assert jnp.allclose(out, ref, rtol=1e-4, atol=1e-4), "mismatch vs reference"

    # Also exercise the other block count (single-block on v7x / two-block on v5e/v6e)
    # to confirm the fusion/padding logic is block-count independent.
    out_alt = jax.block_until_ready(
        augmented_galerkin_steps(x_steps, z_steps, s_steps, prepared,
                                 3 - num_blocks))
    assert jnp.allclose(out_alt, ref, rtol=1e-4, atol=1e-4), "mismatch (alt blocks)"

    print("KERNEL_OK")
</pallas_src>

<mosaic_0001>
module attributes {stable_mosaic.version = 11 : i64} {
  func.func @augmented_galerkin_kernel(%arg0: i32, %arg1: memref<8x16x4xf32, #tpu.memory_space<vmem>>, %arg2: memref<16x384xf32, #tpu.memory_space<vmem>>, %arg3: memref<3x32xf32, #tpu.memory_space<vmem>>, %arg4: memref<1x32xf32, #tpu.memory_space<vmem>>, %arg5: memref<32x384xf32, #tpu.memory_space<vmem>>, %arg6: memref<1x384xf32, #tpu.memory_space<vmem>>, %arg7: memref<16x128xf32, #tpu.memory_space<vmem>>) attributes {dimension_semantics = [#tpu.dimension_semantics<parallel>], iteration_bounds = array<i64: 1>, scalar_prefetch = 0 : i64, scratch_operands = 0 : i64, tpu.core_type = #tpu.core_type<tc>, window_params = [{transform_indices = @transform_0, window_bounds = array<i64: 8, 16, 4>}, {transform_indices = @transform_1, window_bounds = array<i64: 16, 384>}, {pipeline_mode = #tpu.pipeline_mode<synchronous>, transform_indices = @transform_2, window_bounds = array<i64: 3, 32>}, {pipeline_mode = #tpu.pipeline_mode<synchronous>, transform_indices = @transform_3, window_bounds = array<i64: 1, 32>}, {pipeline_mode = #tpu.pipeline_mode<synchronous>, transform_indices = @transform_4, window_bounds = array<i64: 32, 384>}, {pipeline_mode = #tpu.pipeline_mode<synchronous>, transform_indices = @transform_5, window_bounds = array<i64: 1, 384>}, {transform_indices = @transform_6, window_bounds = array<i64: 16, 128>}]} {
    %c0 = arith.constant 0 : index
    %c0_0 = arith.constant 0 : index
    %c0_1 = arith.constant 0 : index
    %0 = vector.load %arg1[%c0, %c0_0, %c0_1] : memref<8x16x4xf32, #tpu.memory_space<vmem>>, vector<8x16x4xf32>
    %1 = vector.shape_cast %0 : vector<8x16x4xf32> to vector<128x4xf32>
    %c0_2 = arith.constant 0 : index
    %c0_3 = arith.constant 0 : index
    %2 = vector.load %arg4[%c0_2, %c0_3] : memref<1x32xf32, #tpu.memory_space<vmem>>, vector<1x32xf32>
    %3 = vector.extract_strided_slice %1 {offsets = [0, 1], sizes = [128, 1], strides = [1, 1]} : vector<128x4xf32> to vector<128x1xf32>
    %c0_4 = arith.constant 0 : index
    %c0_5 = arith.constant 0 : index
    %4 = vector.load %arg3[%c0_4, %c0_5] : memref<3x32xf32, #tpu.memory_space<vmem>>, vector<1x32xf32>
    %5 = vector.broadcast %3 : vector<128x1xf32> to vector<128x32xf32>
    %6 = vector.broadcast %4 : vector<1x32xf32> to vector<128x32xf32>
    %7 = arith.mulf %5, %6 : vector<128x32xf32>
    %8 = vector.broadcast %2 : vector<1x32xf32> to vector<128x32xf32>
    %9 = arith.addf %8, %7 : vector<128x32xf32>
    %10 = vector.extract_strided_slice %1 {offsets = [0, 2], sizes = [128, 1], strides = [1, 1]} : vector<128x4xf32> to vector<128x1xf32>
    %c1 = arith.constant 1 : index
    %c0_6 = arith.constant 0 : index
    %11 = vector.load %arg3[%c1, %c0_6] : memref<3x32xf32, #tpu.memory_space<vmem>>, vector<1x32xf32>
    %12 = vector.broadcast %10 : vector<128x1xf32> to vector<128x32xf32>
    %13 = vector.broadcast %11 : vector<1x32xf32> to vector<128x32xf32>
    %14 = arith.mulf %12, %13 : vector<128x32xf32>
    %15 = arith.addf %9, %14 : vector<128x32xf32>
    %16 = vector.extract_strided_slice %1 {offsets = [0, 3], sizes = [128, 1], strides = [1, 1]} : vector<128x4xf32> to vector<128x1xf32>
    %c2 = arith.constant 2 : index
    %c0_7 = arith.constant 0 : index
    %17 = vector.load %arg3[%c2, %c0_7] : memref<3x32xf32, #tpu.memory_space<vmem>>, vector<1x32xf32>
    %18 = vector.broadcast %16 : vector<128x1xf32> to vector<128x32xf32>
    %19 = vector.broadcast %17 : vector<1x32xf32> to vector<128x32xf32>
    %20 = arith.mulf %18, %19 : vector<128x32xf32>
    %21 = arith.addf %15, %20 : vector<128x32xf32>
    %22 = math.tanh %21 : vector<128x32xf32>
    %c0_8 = arith.constant 0 : index
    %c0_9 = arith.constant 0 : index
    %23 = vector.load %arg5[%c0_8, %c0_9] : memref<32x384xf32, #tpu.memory_space<vmem>>, vector<32x384xf32>
    %cst = arith.constant dense<0.000000e+00> : vector<128x384xf32>
    %24 = tpu.matmul %22, %23, %cst {dimension_numbers = #tpu.dot_dimension_numbers<[1], [0], [0], [1], [0, 0, 1, 1], [], []>} : vector<128x32xf32>, vector<32x384xf32>, vector<128x384xf32> -> vector<128x384xf32>
    %c0_10 = arith.constant 0 : index
    %c0_11 = arith.constant 0 : index
    %25 = vector.load %arg6[%c0_10, %c0_11] : memref<1x384xf32, #tpu.memory_space<vmem>>, vector<1x384xf32>
    %26 = vector.broadcast %25 : vector<1x384xf32> to vector<128x384xf32>
    %27 = arith.addf %24, %26 : vector<128x384xf32>
    %28 = vector.shape_cast %27 : vector<128x384xf32> to vector<8x16x384xf32>
    %c0_12 = arith.constant 0 : index
    %c0_13 = arith.constant 0 : index
    %29 = vector.load %arg2[%c0_12, %c0_13] : memref<16x384xf32, #tpu.memory_space<vmem>>, vector<16x384xf32>
    %30 = vector.shape_cast %29 : vector<16x384xf32> to vector<1x16x384xf32>
    %31 = vector.broadcast %30 : vector<1x16x384xf32> to vector<8x16x384xf32>
    %32 = arith.mulf %28, %31 : vector<8x16x384xf32>
    %33 = vector.extract_strided_slice %32 {offsets = [0, 0, 0], sizes = [8, 16, 128], strides = [1, 1, 1]} : vector<8x16x384xf32> to vector<8x16x128xf32>
    %34 = vector.extract_strided_slice %32 {offsets = [0, 0, 128], sizes = [8, 16, 128], strides = [1, 1, 1]} : vector<8x16x384xf32> to vector<8x16x128xf32>
    %35 = arith.addf %33, %34 : vector<8x16x128xf32>
    %36 = vector.extract_strided_slice %32 {offsets = [0, 0, 256], sizes = [8, 16, 128], strides = [1, 1, 1]} : vector<8x16x384xf32> to vector<8x16x128xf32>
    %37 = arith.addf %35, %36 : vector<8x16x128xf32>
    %c64_i32 = arith.constant 64 : i32
    %38 = tpu.dynamic_rotate %37 by %c64_i32 dim 2 : vector<8x16x128xf32>, i32 -> vector<8x16x128xf32>
    %39 = arith.addf %37, %38 : vector<8x16x128xf32>
    %c32_i32 = arith.constant 32 : i32
    %40 = tpu.dynamic_rotate %39 by %c32_i32 dim 2 : vector<8x16x128xf32>, i32 -> vector<8x16x128xf32>
    %41 = arith.addf %39, %40 : vector<8x16x128xf32>
    %42 = vector.extract_strided_slice %0 {offsets = [0, 0, 0], sizes = [8, 16, 1], strides = [1, 1, 1]} : vector<8x16x4xf32> to vector<8x16x1xf32>
    %43 = vector.extract_strided_slice %41 {offsets = [0, 0, 0], sizes = [8, 16, 16], strides = [1, 1, 1]} : vector<8x16x128xf32> to vector<8x16x16xf32>
    %44 = vector.broadcast %42 : vector<8x16x1xf32> to vector<8x16x16xf32>
    %45 = arith.mulf %44, %43 : vector<8x16x16xf32>
    %46 = vector.extract_strided_slice %41 {offsets = [0, 0, 16], sizes = [8, 16, 16], strides = [1, 1, 1]} : vector<8x16x128xf32> to vector<8x16x16xf32>
    %47 = arith.addf %45, %46 : vector<8x16x16xf32>
    %48 = vector.extract_strided_slice %47 {offsets = [0, 0, 0], sizes = [1, 16, 16], strides = [1, 1, 1]} : vector<8x16x16xf32> to vector<1x16x16xf32>
    %49 = vector.shape_cast %48 : vector<1x16x16xf32> to vector<16x16xf32>
    %c0_14 = arith.constant 0 : index
    %c0_15 = arith.constant 0 : index
    %50 = vector.load %arg7[%c0_14, %c0_15] : memref<16x128xf32, #tpu.memory_space<vmem>>, vector<16x16xf32>
    tpu.vector_store %arg7[%c0_14, %c0_15], %49 {strides = array<i32>} : memref<16x128xf32, #tpu.memory_space<vmem>>, vector<16x16xf32>,
    %51 = vector.extract_strided_slice %47 {offsets = [1, 0, 0], sizes = [1, 16, 16], strides = [1, 1, 1]} : vector<8x16x16xf32> to vector<1x16x16xf32>
    %52 = vector.shape_cast %51 : vector<1x16x16xf32> to vector<16x16xf32>
    %c0_16 = arith.constant 0 : index
    %c16 = arith.constant 16 : index
    %53 = vector.load %arg7[%c0_16, %c16] : memref<16x128xf32, #tpu.memory_space<vmem>>, vector<16x16xf32>
    tpu.vector_store %arg7[%c0_16, %c16], %52 {strides = array<i32>} : memref<16x128xf32, #tpu.memory_space<vmem>>, vector<16x16xf32>,
    %54 = vector.extract_strided_slice %47 {offsets = [2, 0, 0], sizes = [1, 16, 16], strides = [1, 1, 1]} : vector<8x16x16xf32> to vector<1x16x16xf32>
    %55 = vector.shape_cast %54 : vector<1x16x16xf32> to vector<16x16xf32>
    %c0_17 = arith.constant 0 : index
    %c32 = arith.constant 32 : index
    %56 = vector.load %arg7[%c0_17, %c32] : memref<16x128xf32, #tpu.memory_space<vmem>>, vector<16x16xf32>
    tpu.vector_store %arg7[%c0_17, %c32], %55 {strides = array<i32>} : memref<16x128xf32, #tpu.memory_space<vmem>>, vector<16x16xf32>,
    %57 = vector.extract_strided_slice %47 {offsets = [3, 0, 0], sizes = [1, 16, 16], strides = [1, 1, 1]} : vector<8x16x16xf32> to vector<1x16x16xf32>
    %58 = vector.shape_cast %57 : vector<1x16x16xf32> to vector<16x16xf32>
    %c0_18 = arith.constant 0 : index
    %c48 = arith.constant 48 : index
    %59 = vector.load %arg7[%c0_18, %c48] : memref<16x128xf32, #tpu.memory_space<vmem>>, vector<16x16xf32>
    tpu.vector_store %arg7[%c0_18, %c48], %58 {strides = array<i32>} : memref<16x128xf32, #tpu.memory_space<vmem>>, vector<16x16xf32>,
    %60 = vector.extract_strided_slice %47 {offsets = [4, 0, 0], sizes = [1, 16, 16], strides = [1, 1, 1]} : vector<8x16x16xf32> to vector<1x16x16xf32>
    %61 = vector.shape_cast %60 : vector<1x16x16xf32> to vector<16x16xf32>
    %c0_19 = arith.constant 0 : index
    %c64 = arith.constant 64 : index
    %62 = vector.load %arg7[%c0_19, %c64] : memref<16x128xf32, #tpu.memory_space<vmem>>, vector<16x16xf32>
    tpu.vector_store %arg7[%c0_19, %c64], %61 {strides = array<i32>} : memref<16x128xf32, #tpu.memory_space<vmem>>, vector<16x16xf32>,
    %63 = vector.extract_strided_slice %47 {offsets = [5, 0, 0], sizes = [1, 16, 16], strides = [1, 1, 1]} : vector<8x16x16xf32> to vector<1x16x16xf32>
    %64 = vector.shape_cast %63 : vector<1x16x16xf32> to vector<16x16xf32>
    %c0_20 = arith.constant 0 : index
    %c80 = arith.constant 80 : index
    %65 = vector.load %arg7[%c0_20, %c80] : memref<16x128xf32, #tpu.memory_space<vmem>>, vector<16x16xf32>
    tpu.vector_store %arg7[%c0_20, %c80], %64 {strides = array<i32>} : memref<16x128xf32, #tpu.memory_space<vmem>>, vector<16x16xf32>,
    %66 = vector.extract_strided_slice %47 {offsets = [6, 0, 0], sizes = [1, 16, 16], strides = [1, 1, 1]} : vector<8x16x16xf32> to vector<1x16x16xf32>
    %67 = vector.shape_cast %66 : vector<1x16x16xf32> to vector<16x16xf32>
    %c0_21 = arith.constant 0 : index
    %c96 = arith.constant 96 : index
    %68 = vector.load %arg7[%c0_21, %c96] : memref<16x128xf32, #tpu.memory_space<vmem>>, vector<16x16xf32>
    tpu.vector_store %arg7[%c0_21, %c96], %67 {strides = array<i32>} : memref<16x128xf32, #tpu.memory_space<vmem>>, vector<16x16xf32>,
    %69 = vector.extract_strided_slice %47 {offsets = [7, 0, 0], sizes = [1, 16, 16], strides = [1, 1, 1]} : vector<8x16x16xf32> to vector<1x16x16xf32>
    %70 = vector.shape_cast %69 : vector<1x16x16xf32> to vector<16x16xf32>
    %c0_22 = arith.constant 0 : index
    %c112 = arith.constant 112 : index
    %71 = vector.load %arg7[%c0_22, %c112] : memref<16x128xf32, #tpu.memory_space<vmem>>, vector<16x16xf32>
    tpu.vector_store %arg7[%c0_22, %c112], %70 {strides = array<i32>} : memref<16x128xf32, #tpu.memory_space<vmem>>, vector<16x16xf32>,
    return
  }
  func.func @transform_0(%arg0: i32) -> (i32, i32, i32) {
    %c0_i32 = arith.constant 0 : i32
    %c0_i32_0 = arith.constant 0 : i32
    %c0_i32_1 = arith.constant 0 : i32
    return %c0_i32, %arg0, %c0_i32_0 : i32, i32, i32
  }
  func.func @transform_1(%arg0: i32) -> (i32, i32) {
    %c0_i32 = arith.constant 0 : i32
    %c0_i32_0 = arith.constant 0 : i32
    return %arg0, %c0_i32 : i32, i32
  }
  func.func @transform_2(%arg0: i32) -> (i32, i32) {
    %c0_i32 = arith.constant 0 : i32
    %c0_i32_0 = arith.constant 0 : i32
    %c0_i32_1 = arith.constant 0 : i32
    return %c0_i32, %c0_i32_0 : i32, i32
  }
  func.func @transform_3(%arg0: i32) -> (i32, i32) {
    %c0_i32 = arith.constant 0 : i32
    %c0_i32_0 = arith.constant 0 : i32
    %c0_i32_1 = arith.constant 0 : i32
    return %c0_i32, %c0_i32_0 : i32, i32
  }
  func.func @transform_4(%arg0: i32) -> (i32, i32) {
    %c0_i32 = arith.constant 0 : i32
    %c0_i32_0 = arith.constant 0 : i32
    %c0_i32_1 = arith.constant 0 : i32
    return %c0_i32, %c0_i32_0 : i32, i32
  }
  func.func @transform_5(%arg0: i32) -> (i32, i32) {
    %c0_i32 = arith.constant 0 : i32
    %c0_i32_0 = arith.constant 0 : i32
    %c0_i32_1 = arith.constant 0 : i32
    return %c0_i32, %c0_i32_0 : i32, i32
  }
  func.func @transform_6(%arg0: i32) -> (i32, i32) {
    %c0_i32 = arith.constant 0 : i32
    %c0_i32_0 = arith.constant 0 : i32
    return %arg0, %c0_i32 : i32, i32
  }
}

</mosaic_0001>

<bundles_post_ra>
// kernel: augmented_galerkin_steps.1
= control target key start
LH: loop header
LB: loop body
LE: loop exit
PB: predicated region body
PF: predicated region fallthrough
CT: control target
= control target key end

     0   :  { %v1389_v0 = vmov 1   ;;  %v1390_v6 = vmov 3   ;;  %v1391_v8 = vmov 2   ;;  %v1392_v25 = vmov 0.0   ;;  %s1395_s23 = smov 32   ;;  %s1396_s22 = smov 112   ;;  %s2203_s0 = inlined_call_operand.vmem [shape: f32[8,16,4], index: 0, kind: input, shape index: {}]   ;;  %s2204_s4 = inlined_call_operand.vmem [shape: f32[32,384], index: 4, kind: input, shape index: {}]   ;;  %s2205_s2 = inlined_call_operand.vmem [shape: f32[3,32], index: 2, kind: input, shape index: {}]   ;;  %s2206_s3 = inlined_call_operand.vmem [shape: f32[1,32], index: 3, kind: input, shape index: {}]   ;;  %s2207_s5 = inlined_call_operand.vmem [shape: f32[1,384], index: 5, kind: input, shape index: {}]   ;;  %s2208_s1 = inlined_call_operand.vmem [shape: f32[16,384], index: 1, kind: input, shape index: {}]   ;;  %s2209_s6 = inlined_call_operand.vmem [shape: f32[16,128], index: 6, kind: output, shape index: {}]  }
   0x1   :  { %1312 = vset.pattern.permute.xlu1 %v1389_v0  ;;  %1311 = vset.pattern.permute.xlu0 %v1389_v0  ;;  %v24_v1 = vld [vmem:[%s2203_s0 + $0x8] sm:$0xff]  ;;  %v23_v2 = vld [vmem:[%s2203_s0] sm:$0xff]  ;;  %v25_v4 = vld [vmem:[%s2203_s0 + $0x10] sm:$0xff]  ;;  %vm410_vm0 = vcmask 261120   ;;  %s1398_s28 = smov 48   ;;  %s1400_s29 = smov 80  }
   0x2   :  { %48 = vperm.xlu1 %1312, %v24_v1   ;;  %43 = vperm.xlu0 %1311, %v23_v2   ;;  %v35_v3 = vld [vmem:[%s2203_s0 + $0x60] sm:$0xff]  ;;  %v1453_v5 = vld [vmem:[%s2203_s0 + $0x18] sm:$0xff]  ;;  %v1467_v9 = vld [vmem:[%s2203_s0 + $0x28] sm:$0xff]  ;;  %vm1107_vm1 = vcmask 130048   ;;  %vm1118_vm2 = vcmask 261248   ;;  %vm1129_vm3 = vcmask 392448  }
   0x3   :  { %v1460_v7 = vld [vmem:[%s2203_s0 + $0x20] sm:$0xff]  ;;  %v36_v10 = vld [vmem:[%s2203_s0 + $0x68] sm:$0xff]  ;;  %v384_v15 = vld [vmem:[%s2204_s4 + $0x18] sm:$0xff]  ;;  %523 = vmatprep.mubr.f32.mxu0 %v1392_v25  ;;  %595 = vmatprep.mubr.f32.mxu1 %v1392_v25  ;;  %vm1140_vm4 = vcmask 523648   ;;  %vm1151_vm5 = vcmask 654848   ;;  %vm1162_vm6 = vcmask 786048  }
   0x4   :  { %v382_v11 = vld [vmem:[%s2204_s4 + $0x8] sm:$0xff]  ;;  %v385_v12 = vld [vmem:[%s2204_s4 + $0x20] sm:$0xff]  ;;  %v29_v17 = vld [vmem:[%s2203_s0 + $0x30] sm:$0xff]  ;;  %vm1173_vm7 = vcmask 917248   ;;  %vm1184_vm8 = vcmask 1048448  }
   0x5   :  { %v1279_v13 = vpack.c.bf16 %v385_v12, %v382_v11  ;;  %v381_v14 = vld [vmem:[%s2204_s4] sm:$0xff]  ;;  %v388_v18 = vld [vmem:[%s2204_s4 + $0x38] sm:$0xff]  ;;  %v391_v19 = vld [vmem:[%s2204_s4 + $0x50] sm:$0xff] }
   0x6   :  { %103 = vperm.xlu1 %1312, %v35_v3   ;;  %53 = vperm.xlu0 %1311, %v25_v4   ;;  %v1281_v16 = vpack.c.bf16 %v384_v15, %v381_v14  ;;  %v1283_v20 = vpack.c.bf16 %v391_v19, %v388_v18  ;;  %v387_v21 = vld [vmem:[%s2204_s4 + $0x30] sm:$0xff]  ;;  %v390_v22 = vld [vmem:[%s2204_s4 + $0x48] sm:$0xff]  ;;  %v30_v26 = vld [vmem:[%s2203_s0 + $0x38] sm:$0xff] }
   0x7   :  { %1280 = vmatprep.subr.bf16.mxu0 %v1279_v13  ;;  %1295 = vmatprep.subr.bf16.mxu1 %v1279_v13  ;;  %v1285_v23 = vpack.c.bf16 %v390_v22, %v387_v21  ;;  %v37_v24 = vld [vmem:[%s2203_s0 + $0x70] sm:$0xff]  ;;  %v38_v27 = vld [vmem:[%s2203_s0 + $0x78] sm:$0xff]  ;;  %v32_v28 = vld [vmem:[%s2203_s0 + $0x48] sm:$0xff] }
   0x8   :  { %1282 = vmatpush1.bf16.msra.mxu0 %v1281_v16  ;;  %1297 = vmatpush1.bf16.msra.mxu1 %v1281_v16  ;;  %v33_v29 = vld [vmem:[%s2203_s0 + $0x50] sm:$0xff]  ;;  %v386_v31 = vld [vmem:[%s2204_s4 + $0x28] sm:$0xff]  ;;  %v31_v33 = vld [vmem:[%s2203_s0 + $0x40] sm:$0xff] }
   0x9   :  { %1284 = vmatprep.subr.bf16.mxu0 %v1283_v20  ;;  %1296 = vmatprep.subr.bf16.mxu1 %v1283_v20  ;;  %v383_v30 = vld [vmem:[%s2204_s4 + $0x10] sm:$0xff]  ;;  %v1560_v34 = vld [vmem:[%s2203_s0 + $0x58] sm:$0xff]  ;;  %v1575_v43 = vld [vmem:[%s2205_s2] ss:$0 sm:$0xff] }
   0xa   :  { %1313 = vset.pattern.permute.xlu1 %v1390_v6  ;;  %58 = vperm.xlu0 %1311, %v1453_v5   ;;  %v1544_v32 = vpack.c.bf16 %v386_v31, %v383_v30  ;;  %v1583_v46 = vld [vmem:[%s2206_s3] ss:$0 sm:$0xff]  ;;  %v1589_v49 = vld [vmem:[%s2205_s2 + $0x2] ss:$0 sm:$0xff]  ;;  %v1594_v50 = vld [vmem:[%s2205_s2 + $0x1] ss:$0 sm:$0xff] }
   0xb   :  { %266 = vperm.xlu1 %1313, %v23_v2   ;;  %v389_v31 = vld [vmem:[%s2204_s4 + $0x40] sm:$0xff] }
   0xc   :  { %1286 = vmatpush1.bf16.msra.mxu0 %v1285_v23  ;;  %1298 = vmatpush1.bf16.msra.mxu1 %v1285_v23 }
   0xd   :  { %1288 = vmatprep.subr.bf16.mxu1 %v1544_v32 }
   0xe   :  { %63 = vperm.xlu0 %1311, %v1460_v7  }
   0xf   :  { %1314 = vset.pattern.permute.xlu1 %v1391_v8 }
  0x10   :  { %213 = vperm.xlu1 %1314, %v35_v3  }
  0x12   :  { %68 = vperm.xlu0 %1311, %v1467_v9  }
  0x14   :  { %1315 = vset.pattern.permute.xlu1 %v1389_v0 }
  0x15   :  { %108 = vperm.xlu1 %1315, %v36_v10  }
  0x16   :  { %1324 = vset.pattern.permute.xlu0 %v1391_v8 }
  0x17   :  { %165 = vperm.xlu0 %1324, %v23_v2  }
  0x19   :  { %1316 = vset.pattern.permute.xlu1 %v1390_v6 }
  0x1a   :  { %270 = vperm.xlu1 %1316, %v24_v1  }
  0x1b   :  { %169 = vperm.xlu0 %1324, %v24_v1  }
  0x1e   :  { %1317 = vset.pattern.permute.xlu1 %v1391_v8 }
  0x1f   :  { %173 = vperm.xlu1 %1317, %v25_v4   ;;  %185 = vperm.xlu0 %1324, %v1467_v9  }
  0x23   :  { %217 = vperm.xlu1 %1317, %v36_v10   ;;  %189 = vperm.xlu0 %1324, %v29_v17  }
  0x27   :  { %1318 = vset.pattern.permute.xlu1 %v1389_v0  ;;  %1328 = vset.pattern.permute.xlu0 %v1390_v6 }
  0x28   :  { %113 = vperm.xlu1 %1318, %v37_v24   ;;  %314 = vperm.xlu0 %1328, %v35_v3  }
  0x2c   :  { %1319 = vset.pattern.permute.xlu1 %v1390_v6  ;;  %318 = vperm.xlu0 %1328, %v36_v10  }
  0x2d   :  { %274 = vperm.xlu1 %1319, %v25_v4  }
  0x30   :  { %322 = vperm.xlu0 %1328, %v37_v24  }
  0x31   :  { %1320 = vset.pattern.permute.xlu1 %v1391_v8 }
  0x32   :  { %177 = vperm.xlu1 %1320, %v1453_v5  }
  0x34   :  { %290 = vperm.xlu0 %1328, %v29_v17  }
  0x36   :  { %221 = vperm.xlu1 %1320, %v37_v24  }
  0x38   :  { %294 = vperm.xlu0 %1328, %v30_v26  }
  0x3a   :  { %1321 = vset.pattern.permute.xlu1 %v1389_v0 }
  0x3b   :  { %118 = vperm.xlu1 %1321, %v38_v27  }
  0x3c   :  { %1333 = vset.pattern.permute.xlu0 %v1389_v0 }
  0x3d   :  { %88 = vperm.xlu0 %1333, %v32_v28  }
  0x3f   :  { %1322 = vset.pattern.permute.xlu1 %v1390_v6 }
  0x40   :  { %278 = vperm.xlu1 %1322, %v1453_v5  }
  0x41   :  { %93 = vperm.xlu0 %1333, %v33_v29  }
  0x44   :  { %1323 = vset.pattern.permute.xlu1 %v1391_v8 }
  0x45   :  { %181 = vperm.xlu1 %1323, %v1460_v7   ;;  %1337 = vset.pattern.permute.xlu0 %v1390_v6 }
  0x46   :  { %302 = vperm.xlu0 %1337, %v32_v28  }
  0x49   :  { %225 = vperm.xlu1 %1323, %v38_v27  }
  0x4a   :  { %306 = vperm.xlu0 %1337, %v33_v29  }
  0x4d   :  { %1325 = vset.pattern.permute.xlu1 %v1390_v6 }
  0x4e   :  { %282 = vperm.xlu1 %1325, %v1460_v7  }
  0x52   :  { %326 = vperm.xlu1 %1325, %v38_v27  }
  0x56   :  { %1326 = vset.pattern.permute.xlu1 %v1389_v0 }
  0x57   :  { %73 = vperm.xlu1 %1326, %v29_v17  }
  0x5b   :  { %1327 = vset.pattern.permute.xlu1 %v1390_v6 }
  0x5c   :  { %286 = vperm.xlu1 %1327, %v1467_v9  }
  0x60   :  { %1329 = vset.pattern.permute.xlu1 %v1389_v0 }
  0x61   :  { %78 = vperm.xlu1 %1329, %v30_v26  }
  0x65   :  { %1330 = vset.pattern.permute.xlu1 %v1391_v8 }
  0x66   :  { %193 = vperm.xlu1 %1330, %v30_v26  }
  0x6a   :  { %1331 = vset.pattern.permute.xlu1 %v1389_v0 }
  0x6b   :  { %83 = vperm.xlu1 %1331, %v31_v33  }
  0x6f   :  { %1332 = vset.pattern.permute.xlu1 %v1391_v8 }
  0x70   :  { %197 = vperm.xlu1 %1332, %v31_v33  }
  0x74   :  { %1334 = vset.pattern.permute.xlu1 %v1390_v6 }
  0x75   :  { %298 = vperm.xlu1 %1334, %v31_v33   ;;  %v392_v33 = vld [vmem:[%s2204_s4 + $0x58] sm:$0xff] }
  0x79   :  { %1335 = vset.pattern.permute.xlu1 %v1391_v8 }
  0x7a   :  { %201 = vperm.xlu1 %1335, %v32_v28  }
  0x7e   :  { %1336 = vset.pattern.permute.xlu1 %v1389_v0 }
  0x7f   :  { %98 = vperm.xlu1 %1336, %v1560_v34  }
  0x81   :  { %v49_v35 = vpop.permute.xlu1 %48  ;;  %v44_v36 = vpop.permute.xlu0 %43 }
  0x82   :  { %v125_v44 = vmul.f32 %v1575_v43, %v44_v36  ;;  %v126_v52 = vmul.f32 %v1575_v43, %v49_v35 }
  0x83   :  { %1338 = vset.pattern.permute.xlu1 %v1391_v8 }
  0x84   :  { %205 = vperm.xlu1 %1338, %v33_v29   ;;  %v147_v48 = vadd.f32 %v1583_v46, %v125_v44  ;;  %v148_v58 = vadd.f32 %v1583_v46, %v126_v52 }
  0x85   :  { %v104_v37 = vpop.permute.xlu1 %103  ;;  %v54_v38 = vpop.permute.xlu0 %53 }
  0x86   :  { %v137_v2 = vmul.f32 %v1575_v43, %v104_v37  ;;  %v1291_v37 = vpack.c.bf16 %v392_v33, %v389_v31 }
  0x88   :  { %209 = vperm.xlu1 %1338, %v1560_v34   ;;  %v159_v7 = vadd.f32 %v1583_v46, %v137_v2 }
  0x89   :  { %v1566_v39 = vpop.permute.xlu0 %58 }
  0x8a   :  { %v267_v40 = vpop.permute.xlu1 %266 }
  0x8b   :  { %v333_v54 = vmul.f32 %v1589_v49, %v267_v40 }
  0x8c   :  { %1339 = vset.pattern.permute.xlu1 %v1390_v6  ;;  %v127_v6 = vmul.f32 %v1575_v43, %v54_v38 }
  0x8d   :  { %310 = vperm.xlu1 %1339, %v1560_v34   ;;  %v1570_v41 = vpop.permute.xlu0 %63 }
  0x8e   :  { %v149_v15 = vadd.f32 %v1583_v46, %v127_v6 }
  0x8f   :  { %v214_v42 = vpop.permute.xlu1 %213 }
  0x90   :  { %v244_v5 = vmul.f32 %v1594_v50, %v214_v42 }
  0x91   :  { %v1578_v45 = vpop.permute.xlu0 %68 }
  0x92   :  { %v260_v12 = vadd.f32 %v244_v5, %v159_v7 }
  0x94   :  { %v109_v47 = vpop.permute.xlu1 %108 }
  0x95   :  { %v138_v8 = vmul.f32 %v1575_v43, %v109_v47  ;;  %v128_v47 = vmul.f32 %v1575_v43, %v1566_v39 }
  0x96   :  { %v166_v51 = vpop.permute.xlu0 %165 }
  0x97   :  { %v232_v53 = vmul.f32 %v1594_v50, %v166_v51  ;;  %v160_v17 = vadd.f32 %v1583_v46, %v138_v8 }
  0x99   :  { %v248_v55 = vadd.f32 %v232_v53, %v147_v48  ;;  %v271_v56 = vpop.permute.xlu1 %270 }
  0x9a   :  { %v170_v57 = vpop.permute.xlu0 %169  ;;  %v334_v61 = vmul.f32 %v1589_v49, %v271_v56 }
  0x9b   :  { %v349_v59 = vadd.f32 %v333_v54, %v248_v55  ;;  %v233_v60 = vmul.f32 %v1594_v50, %v170_v57  ;;  %v150_v55 = vadd.f32 %v1583_v46, %v128_v47 }
  0x9d   :  { %1342 = vtanh.f32 %v349_v59  ;;  %v249_v62 = vadd.f32 %v233_v60, %v148_v58 }
  0x9e   :  { %v174_v63 = vpop.permute.xlu1 %173  ;;  %v1602_v0 = vpop.permute.xlu0 %185 }
  0x9f   :  { %v350_v1 = vadd.f32 %v334_v61, %v249_v62  ;;  %v234_v16 = vmul.f32 %v1594_v50, %v174_v63  ;;  %v129_v61 = vmul.f32 %v1575_v43, %v1570_v41 }
  0xa1   :  { %1344 = vtanh.f32 %v350_v1  ;;  %v250_v24 = vadd.f32 %v234_v16, %v149_v15  ;;  %v151_v63 = vadd.f32 %v1583_v46, %v129_v61 }
  0xa2   :  { %v218_v3 = vpop.permute.xlu1 %217  ;;  %v1605_v4 = vpop.permute.xlu0 %189 }
  0xa3   :  { %v245_v13 = vmul.f32 %v1594_v50, %v218_v3 }
  0xa5   :  { %v261_v21 = vadd.f32 %v245_v13, %v160_v17  ;;  %v238_v17 = vmul.f32 %v1594_v50, %v1605_v4 }
  0xa7   :  { %v1611_v9 = vpop.eup %1342  ;;  %v114_v10 = vpop.permute.xlu1 %113 }
  0xa8   :  { %v315_v11 = vpop.permute.xlu0 %314  ;;  %1195 = vmatmul.mubr.msk.f32.vlgmr.msra.gmra.mrb[0].mxu0 %vm410_vm0, %v1611_v9  ;;  %v139_v30 = vmul.f32 %v1575_v43, %v114_v10 }
  0xa9   :  { %v345_v14 = vmul.f32 %v1589_v49, %v315_v11  ;;  %529 = vmatprep.mubr.f32.mxu0 %v1392_v25 }
  0xaa   :  { %v161_v40 = vadd.f32 %v1583_v46, %v139_v30 }
  0xab   :  { %v361_v18 = vadd.f32 %v345_v14, %v260_v12  ;;  %v1621_v19 = vpop.eup %1344  ;;  %v130_v14 = vmul.f32 %v1575_v43, %v1578_v45 }
  0xac   :  { %v319_v20 = vpop.permute.xlu0 %318  ;;  %v275_v23 = vpop.permute.xlu1 %274  ;;  %1196 = vmatmul.mubr.msk.f32.gmra.mrb[2].mxu0 %vm410_vm0, %v1621_v19 }
  0xad   :  { %1346 = vtanh.f32 %v361_v18  ;;  %v346_v22 = vmul.f32 %v1589_v49, %v319_v20  ;;  %v335_v26 = vmul.f32 %v1589_v49, %v275_v23  ;;  %535 = vmatprep.mubr.f32.mxu0 %v1392_v25  ;;  %v152_v20 = vadd.f32 %v1583_v46, %v130_v14 }
  0xaf   :  { %v362_v27 = vadd.f32 %v346_v22, %v261_v21  ;;  %v351_v28 = vadd.f32 %v335_v26, %v250_v24  ;;  %v237_v21 = vmul.f32 %v1594_v50, %v1602_v0 }
  0xb0   :  { %v323_v35 = vpop.permute.xlu0 %322 }
  0xb1   :  { %1348 = vtanh.f32 %v362_v27  ;;  %v178_v29 = vpop.permute.xlu1 %177  ;;  %v347_v44 = vmul.f32 %v1589_v49, %v323_v35 }
  0xb2   :  { %1350 = vtanh.f32 %v351_v28  ;;  %v235_v56 = vmul.f32 %v1594_v50, %v178_v29  ;;  %v253_v28 = vadd.f32 %v237_v21, %v152_v20 }
  0xb4   :  { %v251_v39 = vadd.f32 %v235_v56, %v150_v55  ;;  %v291_v22 = vpop.permute.xlu0 %290 }
  0xb5   :  { %v222_v36 = vpop.permute.xlu1 %221  ;;  %v339_v26 = vmul.f32 %v1589_v49, %v291_v22 }
  0xb6   :  { %v246_v42 = vmul.f32 %v1594_v50, %v222_v36 }
  0xb7   :  { %v1635_v38 = vpop.eup %1346 }
  0xb8   :  { %1207 = vmatmul.mubr.msk.f32.vlgmr.msra.gmra.mrb[0].mxu1 %vm410_vm0, %v1635_v38  ;;  %v262_v48 = vadd.f32 %v246_v42, %v161_v40  ;;  %v295_v35 = vpop.permute.xlu0 %294 }
  0xb9   :  { %601 = vmatprep.mubr.f32.mxu1 %v1392_v25  ;;  %1290 = vmatpush3.bf16.msra.mxu1 %v1544_v32  ;;  %v340_v42 = vmul.f32 %v1589_v49, %v295_v35 }
  0xba   :  { %1292 = vmatprep.subr.bf16.mxu1 %v1291_v37  ;;  %v363_v52 = vadd.f32 %v347_v44, %v262_v48  ;;  %v119_v53 = vpop.permute.xlu1 %118 }
  0xbb   :  { %v1646_v51 = vpop.eup %1348  ;;  %v140_v2 = vmul.f32 %v1575_v43, %v119_v53 }
  0xbc   :  { %v1648_v54 = vpop.eup %1350  ;;  %1208 = vmatmul.mubr.msk.f32.gmra.mrb[2].mxu1 %vm410_vm0, %v1646_v51  ;;  %1352 = vtanh.f32 %v363_v52 }
  0xbd   :  { %1197 = vmatmul.mubr.msk.f32.gmra.mrb[4].mxu0 %vm410_vm0, %v1648_v54  ;;  %607 = vmatprep.mubr.f32.mxu1 %v1392_v25  ;;  %v162_v41 = vadd.f32 %v1583_v46, %v140_v2 }
  0xbe   :  { %541 = vmatprep.mubr.f32.mxu0 %v1392_v25  ;;  %1294 = vmatpush3.bf16.msra.mxu1 %v1291_v37 }
  0xbf   :  { %v279_v32 = vpop.permute.xlu1 %278 }
  0xc0   :  { %v336_v57 = vmul.f32 %v1589_v49, %v279_v32 }
  0xc2   :  { %v352_v58 = vadd.f32 %v336_v57, %v251_v39 }
  0xc4   :  { %1354 = vtanh.f32 %v352_v58  ;;  %v182_v59 = vpop.permute.xlu1 %181 }
  0xc5   :  { %v236_v1 = vmul.f32 %v1594_v50, %v182_v59 }
  0xc6   :  { %v1659_v60 = vpop.eup %1352 }
  0xc7   :  { %1209 = vmatmul.mubr.msk.f32.gmra.mrb[4].mxu1 %vm410_vm0, %v1659_v60  ;;  %v252_v6 = vadd.f32 %v236_v1, %v151_v63 }
  0xc8   :  { %v226_v62 = vpop.permute.xlu1 %225  ;;  %613 = vmatprep.mubr.f32.mxu1 %v1392_v25 }
  0xc9   :  { %v247_v7 = vmul.f32 %v1594_v50, %v226_v62 }
  0xcb   :  { %v263_v12 = vadd.f32 %v247_v7, %v162_v41 }
  0xcd   :  { %v283_v3 = vpop.permute.xlu1 %282 }
  0xce   :  { %v1355_v5 = vpop.eup %1354  ;;  %v337_v8 = vmul.f32 %v1589_v49, %v283_v3 }
  0xcf   :  { %1198 = vmatmul.mubr.msk.f32.gmra.mrb[6].mxu0 %vm410_vm0, %v1355_v5 }
  0xd0   :  { %v353_v10 = vadd.f32 %v337_v8, %v252_v6  ;;  %547 = vmatprep.mubr.f32.mxu0 %v1392_v25 }
  0xd1   :  { %v327_v11 = vpop.permute.xlu1 %326 }
  0xd2   :  { %1356 = vtanh.f32 %v353_v10  ;;  %v348_v13 = vmul.f32 %v1589_v49, %v327_v11 }
  0xd4   :  { %v364_v15 = vadd.f32 %v348_v13, %v263_v12 }
  0xd6   :  { %1358 = vtanh.f32 %v364_v15  ;;  %v74_v16 = vpop.permute.xlu1 %73 }
  0xd7   :  { %v131_v18 = vmul.f32 %v1575_v43, %v74_v16 }
  0xd9   :  { %v153_v23 = vadd.f32 %v1583_v46, %v131_v18 }
  0xdb   :  { %v254_v24 = vadd.f32 %v238_v17, %v153_v23  ;;  %v287_v45 = vpop.permute.xlu1 %286 }
  0xdc   :  { %v1357_v27 = vpop.eup %1356  ;;  %v338_v29 = vmul.f32 %v1589_v49, %v287_v45 }
  0xdd   :  { %1199 = vmatmul.mubr.msk.f32.gmra.mrb[8].mxu0 %vm410_vm0, %v1357_v27  ;;  %v355_v30 = vadd.f32 %v339_v26, %v254_v24 }
  0xde   :  { %v354_v4 = vadd.f32 %v338_v29, %v253_v28  ;;  %553 = vmatprep.mubr.f32.mxu0 %v1392_v25  ;;  %v1754_v28 = vld [vmem:[%s2207_s5] sm:$0x7] }
  0xe0   :  { %v1688_v31 = vpop.eup %1358  ;;  %1360 = vtanh.f32 %v354_v4  ;;  %v79_v0 = vpop.permute.xlu1 %78  ;;  %v1766_v4 = vld [vmem:[%s2208_s1] sm:$0xff] }
  0xe1   :  { %1210 = vmatmul.mubr.msk.f32.gmra.mrb[6].mxu1 %vm410_vm0, %v1688_v31  ;;  %v132_v33 = vmul.f32 %v1575_v43, %v79_v0  ;;  %1362 = vtanh.f32 %v355_v30  ;;  %v1772_v0 = vld [vmem:[%s2208_s1 + $0x8] sm:$0xff] }
  0xe2   :  { %1255 = vmatprep.mubr.msk.f32.mxu1 %vm410_vm0, %v1611_v9 }
  0xe3   :  { %v154_v37 = vadd.f32 %v1583_v46, %v132_v33 }
  0xe5   :  { %v194_v36 = vpop.permute.xlu1 %193  ;;  %1256 = vmatmul.mubr.msk.f32.vlgmr.msra.gmra.mrb[8].mxu1 %vm410_vm0, %v1621_v19  ;;  %v89_v19 = vpop.permute.xlu0 %88 }
  0xe6   :  { %v239_v40 = vmul.f32 %v1594_v50, %v194_v36  ;;  %1258 = vmatprep.mubr.msk.f32.mxu1 %vm410_vm0, %v1648_v54  ;;  %v134_v39 = vmul.f32 %v1575_v43, %v89_v19 }
  0xe8   :  { %v255_v44 = vadd.f32 %v239_v40, %v154_v37  ;;  %v156_v1 = vadd.f32 %v1583_v46, %v134_v39  ;;  %v1780_v40 = vld [vmem:[%s2208_s1 + $0x18] sm:$0xff] }
  0xe9   :  { %1259 = vmatmul.mubr.msk.f32.gmra.mrb[10].mxu1 %vm410_vm0, %v1355_v5  ;;  %v94_v56 = vpop.permute.xlu0 %93 }
  0xea   :  { %v1361_v47 = vpop.eup %1360  ;;  %v356_v9 = vadd.f32 %v340_v42, %v255_v44  ;;  %v84_v48 = vpop.permute.xlu1 %83  ;;  %1261 = vmatprep.mubr.msk.f32.mxu1 %vm410_vm0, %v1357_v27  ;;  %v135_v41 = vmul.f32 %v1575_v43, %v94_v56 }
  0xeb   :  { %1200 = vmatmul.mubr.msk.f32.gmra.mrb[10].mxu0 %vm410_vm0, %v1361_v47  ;;  %v1363_v52 = vpop.eup %1362  ;;  %v133_v53 = vmul.f32 %v1575_v43, %v84_v48 }
  0xec   :  { %1364 = vtanh.f32 %v356_v9  ;;  %559 = vmatprep.mubr.f32.mxu0 %v1392_v25  ;;  %v157_v13 = vadd.f32 %v1583_v46, %v135_v41 }
  0xed   :  { %1262 = vmatmul.mubr.msk.f32.gmra.mrb[12].mxu1 %vm410_vm0, %v1361_v47  ;;  %v155_v32 = vadd.f32 %v1583_v46, %v133_v53  ;;  %v303_v63 = vpop.permute.xlu0 %302  ;;  %v1786_v47 = vld [vmem:[%s2208_s1 + $0x20] sm:$0xff] }
  0xee   :  { %1264 = vmatprep.mubr.msk.f32.mxu1 %vm410_vm0, %v1363_v52  ;;  %v342_v5 = vmul.f32 %v1589_v49, %v303_v63 }
  0xef   :  { %v198_v54 = vpop.permute.xlu1 %197  ;;  %1201 = vmatmul.mubr.msk.f32.gmra.mrb[12].mxu0 %vm410_vm0, %v1363_v52 }
  0xf0   :  { %565 = vmatprep.mubr.f32.mxu0 %v1392_v25  ;;  %v240_v55 = vmul.f32 %v1594_v50, %v198_v54 }
  0xf1   :  { %v307_v10 = vpop.permute.xlu0 %306 }
  0xf2   :  { %v256_v58 = vadd.f32 %v240_v55, %v155_v32  ;;  %v343_v15 = vmul.f32 %v1589_v49, %v307_v10 }
  0xf4   :  { %v299_v57 = vpop.permute.xlu1 %298 }
  0xf5   :  { %v341_v59 = vmul.f32 %v1589_v49, %v299_v57 }
  0xf6   :  { %v1365_v61 = vpop.eup %1364 }
  0xf7   :  { %v357_v62 = vadd.f32 %v341_v59, %v256_v58  ;;  %1202 = vmatmul.mubr.msk.f32.gmra.mrb[14].mxu0 %vm410_vm0, %v1365_v61  ;;  %1265 = vmatmul.mubr.msk.f32.gmra.mrb[14].mxu1 %vm410_vm0, %v1365_v61 }
  0xf8   :  { %571 = vmatprep.mubr.f32.mxu0 %v1392_v25 }
  0xf9   :  { %1366 = vtanh.f32 %v357_v62  ;;  %v202_v2 = vpop.permute.xlu1 %201 }
  0xfa   :  { %v241_v3 = vmul.f32 %v1594_v50, %v202_v2 }
  0xfc   :  { %v257_v6 = vadd.f32 %v241_v3, %v156_v1 }
  0xfe   :  { %v358_v7 = vadd.f32 %v342_v5, %v257_v6  ;;  %v99_v8 = vpop.permute.xlu1 %98 }
  0xff   :  { %v136_v17 = vmul.f32 %v1575_v43, %v99_v8 }
 0x100   :  { %1368 = vtanh.f32 %v358_v7 }
 0x101   :  { %v158_v23 = vadd.f32 %v1583_v46, %v136_v17 }
 0x103   :  { %v1367_v11 = vpop.eup %1366  ;;  %v206_v12 = vpop.permute.xlu1 %205 }
 0x104   :  { %v242_v14 = vmul.f32 %v1594_v50, %v206_v12  ;;  %1203 = vmatmul.mubr.msk.f32.gmra.mrb[16].mxu0 %vm410_vm0, %v1367_v11  ;;  %1267 = vmatprep.mubr.msk.f32.mxu1 %vm410_vm0, %v1367_v11 }
 0x105   :  { %577 = vmatprep.mubr.f32.mxu0 %v1392_v25 }
 0x106   :  { %v258_v16 = vadd.f32 %v242_v14, %v157_v13 }
 0x107   :  { %v210_v18 = vpop.permute.xlu1 %209 }
 0x108   :  { %v359_v20 = vadd.f32 %v343_v15, %v258_v16  ;;  %v243_v21 = vmul.f32 %v1594_v50, %v210_v18 }
 0x10a   :  { %v1369_v22 = vpop.eup %1368  ;;  %1370 = vtanh.f32 %v359_v20  ;;  %v259_v26 = vadd.f32 %v243_v21, %v158_v23 }
 0x10b   :  { %1204 = vmatmul.mubr.msk.f32.gmra.mrb[18].mxu0 %vm410_vm0, %v1369_v22  ;;  %1268 = vmatmul.mubr.msk.f32.gmra.mrb[16].mxu1 %vm410_vm0, %v1369_v22 }
 0x10c   :  { %v311_v24 = vpop.permute.xlu1 %310  ;;  %583 = vmatprep.mubr.f32.mxu0 %v1392_v25 }
 0x10d   :  { %v344_v45 = vmul.f32 %v1589_v49, %v311_v24  ;;  %v395_v49 = vlaneseq }
 0x10f   :  { %v360_v27 = vadd.f32 %v344_v45, %v259_v26  ;;  %v1748_v50 = vshrl.u32 %v395_v49, 7 }
 0x111   :  { %1372 = vtanh.f32 %v360_v27  ;;  %v405_v49 = vsub.s32 2, %v1748_v50 }
 0x114   :  { %v1371_v43 = vpop.eup %1370 }
 0x115   :  { %1205 = vmatmul.mubr.msk.f32.gmra.mrb[20].mxu0 %vm410_vm0, %v1371_v43  ;;  %1270 = vmatprep.mubr.msk.f32.mxu1 %vm410_vm0, %v1371_v43 }
 0x116   :  { %589 = vmatprep.mubr.f32.mxu0 %v1392_v25  ;;  %v397_v25 = vsub.s32 0, %v1748_v50 }
 0x11b   :  { %v1373_v46 = vpop.eup %1372 }
 0x11c   :  { %1206 = vmatmul.mubr.msk.f32.gmra.mrb[22].mxu0 %vm410_vm0, %v1373_v46  ;;  %1271 = vmatmul.mubr.msk.f32.gmra.mrb[18].mxu1 %vm410_vm0, %v1373_v46 }
 0x11d   :  { %1273 = vmatprep.mubr.msk.f32.mxu1 %vm410_vm0, %v1635_v38  ;;  %v401_v38 = vsub.s32 1, %v1748_v50 }
 0x120   :  { %1274 = vmatmul.mubr.msk.f32.gmra.mrb[20].mxu1 %vm410_vm0, %v1646_v51  ;;  %v1758_v51 = vrot.slane %v1754_v28, %v397_v25 }
 0x121   :  { %1276 = vmatprep.mubr.msk.f32.mxu1 %vm410_vm0, %v1659_v60  ;;  %v1761_v60 = vrot.slane %v1754_v28, %v401_v38 }
 0x124   :  { %1277 = vmatmul.mubr.msk.f32.gmra.mrb[22].mxu1 %vm410_vm0, %v1688_v31 }
 0x17b   :  { %v525_v29 = vpop.f32.mrb[0].mxu0 }
 0x17c   :  { %v526_v30 = vadd.f32 %v525_v29, %v1758_v51  ;;  %v527_v31 = vpop.f32.mrb[1].mxu0 }
 0x17d   :  { %v528_v33 = vadd.f32 %v527_v31, %v1761_v60 }
 0x17e   :  { %v771_v35 = vmul.f32 %v1766_v4, %v526_v30 }
 0x17f   :  { %v772_v36 = vmul.f32 %v1772_v0, %v528_v33  ;;  %v531_v37 = vpop.f32.mrb[2].mxu0 }
 0x180   :  { %v532_v42 = vadd.f32 %v531_v37, %v1758_v51  ;;  %v533_v44 = vpop.f32.mrb[3].mxu0 }
 0x181   :  { %v1788_v9 = vadd.f32 %v772_v36, %v771_v35  ;;  %v534_v48 = vadd.f32 %v533_v44, %v1761_v60  ;;  %v1828_v35 = vrot.slane %v1754_v28, %v405_v49  ;;  %v1842_v28 = vld [vmem:[%s2208_s1 + $0x10] sm:$0xff] }
 0x182   :  { %v774_v19 = vmul.f32 %v1780_v40, %v532_v42 }
 0x183   :  { %v775_v52 = vmul.f32 %v1786_v47, %v534_v48  ;;  %v1836_v48 = vld [vmem:[%s2208_s1 + $0x28] sm:$0xff]  ;;  %s1393_s1 = smov 64  }
 0x185   :  { %v1793_v53 = vadd.f32 %v775_v52, %v774_v19 }
 0x18b   :  { %v597_v54 = vpop.f32.mrb[0].mxu1 }
 0x18c   :  { %v598_v55 = vadd.f32 %v597_v54, %v1758_v51  ;;  %v599_v56 = vpop.f32.mrb[1].mxu1 }
 0x18d   :  { %v600_v32 = vadd.f32 %v599_v56, %v1761_v60 }
 0x18e   :  { %v807_v39 = vmul.f32 %v1766_v4, %v598_v55 }
 0x18f   :  { %v808_v57 = vmul.f32 %v1772_v0, %v600_v32  ;;  %v603_v58 = vpop.f32.mrb[2].mxu1 }
 0x190   :  { %v604_v59 = vadd.f32 %v603_v58, %v1758_v51  ;;  %v537_v61 = vpop.f32.mrb[4].mxu0  ;;  %v605_v62 = vpop.f32.mrb[3].mxu1 }
 0x191   :  { %v1800_v63 = vadd.f32 %v808_v57, %v807_v39  ;;  %v538_v1 = vadd.f32 %v537_v61, %v1758_v51  ;;  %v606_v2 = vadd.f32 %v605_v62, %v1761_v60  ;;  %v539_v3 = vpop.f32.mrb[5].mxu0 }
 0x192   :  { %v810_v5 = vmul.f32 %v1780_v40, %v604_v59  ;;  %v540_v6 = vadd.f32 %v539_v3, %v1761_v60 }
 0x193   :  { %v777_v7 = vmul.f32 %v1766_v4, %v538_v1  ;;  %v811_v8 = vmul.f32 %v1786_v47, %v606_v2 }
 0x194   :  { %v778_v41 = vmul.f32 %v1772_v0, %v540_v6 }
 0x195   :  { %v1809_v10 = vadd.f32 %v811_v8, %v810_v5 }
 0x196   :  { %v821_v11 = vadd.f32 %v778_v41, %v777_v7 }
 0x19a   :  { %v609_v12 = vpop.f32.mrb[4].mxu1 }
 0x19b   :  { %v610_v13 = vadd.f32 %v609_v12, %v1758_v51  ;;  %v611_v14 = vpop.f32.mrb[5].mxu1 }
 0x19c   :  { %v612_v15 = vadd.f32 %v611_v14, %v1761_v60 }
 0x19d   :  { %v813_v16 = vmul.f32 %v1766_v4, %v610_v13 }
 0x19e   :  { %v814_v17 = vmul.f32 %v1772_v0, %v612_v15 }
 0x1a0   :  { %v1815_v18 = vadd.f32 %v814_v17, %v813_v16 }
 0x1a2   :  { %v543_v20 = vpop.f32.mrb[6].mxu0 }
 0x1a3   :  { %v544_v21 = vadd.f32 %v543_v20, %v1758_v51  ;;  %v545_v22 = vpop.f32.mrb[7].mxu0 }
 0x1a4   :  { %v546_v23 = vadd.f32 %v545_v22, %v1761_v60 }
 0x1a5   :  { %v780_v24 = vmul.f32 %v1780_v40, %v544_v21 }
 0x1a6   :  { %v781_v26 = vmul.f32 %v1786_v47, %v546_v23 }
 0x1a8   :  { %v822_v45 = vadd.f32 %v781_v26, %v780_v24 }
 0x1b0   :  { %v549_v27 = vpop.f32.mrb[8].mxu0 }
 0x1b1   :  { %v550_v43 = vadd.f32 %v549_v27, %v1758_v51  ;;  %v551_v46 = vpop.f32.mrb[9].mxu0 }
 0x1b2   :  { %v552_v25 = vadd.f32 %v551_v46, %v1761_v60 }
 0x1b3   :  { %v783_v38 = vmul.f32 %v1766_v4, %v550_v43 }
 0x1b4   :  { %v784_v29 = vmul.f32 %v1772_v0, %v552_v25  ;;  %v615_v30 = vpop.f32.mrb[6].mxu1 }
 0x1b5   :  { %v616_v31 = vadd.f32 %v615_v30, %v1758_v51  ;;  %v617_v33 = vpop.f32.mrb[7].mxu1 }
 0x1b6   :  { %v823_v36 = vadd.f32 %v784_v29, %v783_v38  ;;  %v618_v37 = vadd.f32 %v617_v33, %v1761_v60 }
 0x1b7   :  { %v816_v42 = vmul.f32 %v1780_v40, %v616_v31 }
 0x1b8   :  { %v817_v50 = vmul.f32 %v1786_v47, %v618_v37  ;;  %v1257_v44 = vpop.f32.mrb[8].mxu1 }
 0x1b9   :  { %v692_v19 = vadd.f32 %v1257_v44, %v1828_v35  ;;  %v686_v52 = vpop.f32.mrb[9].mxu1 }
 0x1ba   :  { %v1844_v54 = vadd.f32 %v817_v50, %v816_v42  ;;  %v687_v55 = vadd.f32 %v686_v52, %v1828_v35 }
 0x1bb   :  { %v776_v56 = vmul.f32 %v1836_v48, %v692_v19 }
 0x1bc   :  { %v773_v32 = vmul.f32 %v1842_v28, %v687_v55  ;;  %v1260_v39 = vpop.f32.mrb[10].mxu1 }
 0x1bd   :  { %v702_v57 = vadd.f32 %v1260_v39, %v1828_v35  ;;  %v696_v58 = vpop.f32.mrb[11].mxu1  ;;  %v1851_v59 = vadd.f32 %v1793_v53, %v776_v56 }
 0x1be   :  { %v697_v61 = vadd.f32 %v696_v58, %v1828_v35  ;;  %v555_v62 = vpop.f32.mrb[10].mxu0  ;;  %v1855_v1 = vadd.f32 %v1788_v9, %v773_v32 }
 0x1bf   :  { %v782_v2 = vmul.f32 %v1836_v48, %v702_v57  ;;  %v556_v3 = vadd.f32 %v555_v62, %v1758_v51  ;;  %v557_v5 = vpop.f32.mrb[11].mxu0 }
 0x1c0   :  { %v779_v6 = vmul.f32 %v1842_v28, %v697_v61  ;;  %v558_v7 = vadd.f32 %v557_v5, %v1761_v60  ;;  %v1263_v8 = vpop.f32.mrb[12].mxu1 }
 0x1c1   :  { %v786_v41 = vmul.f32 %v1780_v40, %v556_v3  ;;  %v712_v53 = vadd.f32 %v1263_v8, %v1828_v35  ;;  %v706_v12 = vpop.f32.mrb[13].mxu1  ;;  %v1863_v13 = vadd.f32 %v822_v45, %v782_v2 }
 0x1c2   :  { %v787_v9 = vmul.f32 %v1786_v47, %v558_v7  ;;  %v707_v14 = vadd.f32 %v706_v12, %v1828_v35  ;;  %v561_v15 = vpop.f32.mrb[12].mxu0  ;;  %v1867_v16 = vadd.f32 %v821_v11, %v779_v6 }
 0x1c3   :  { %v788_v17 = vmul.f32 %v1836_v48, %v712_v53  ;;  %v562_v20 = vadd.f32 %v561_v15, %v1758_v51  ;;  %857 = vrot.lane.b32.xlu1 %v1863_v13, %s1393_s1  ;;  %v563_v21 = vpop.f32.mrb[13].mxu0 }
 0x1c4   :  { %v824_v22 = vadd.f32 %v787_v9, %v786_v41  ;;  %v785_v23 = vmul.f32 %v1842_v28, %v707_v14  ;;  %v564_v24 = vadd.f32 %v563_v21, %v1761_v60  ;;  %855 = vrot.lane.b32.xlu0 %v1867_v16, %s1393_s1 }
 0x1c5   :  { %v789_v11 = vmul.f32 %v1766_v4, %v562_v20 }
 0x1c6   :  { %v790_v26 = vmul.f32 %v1772_v0, %v564_v24  ;;  %v1879_v45 = vadd.f32 %v824_v22, %v788_v17  ;;  %v1881_v27 = vadd.f32 %v823_v36, %v785_v23 }
 0x1c8   :  { %v825_v43 = vadd.f32 %v790_v26, %v789_v11  ;;  %861 = vrot.lane.b32.xlu1 %v1879_v45, %s1393_s1  ;;  %859 = vrot.lane.b32.xlu0 %v1881_v27, %s1393_s1 }
 0x1ca   :  { %v567_v46 = vpop.f32.mrb[14].mxu0  ;;  %v1266_v49 = vpop.f32.mrb[14].mxu1 }
 0x1cb   :  { %v568_v25 = vadd.f32 %v567_v46, %v1758_v51  ;;  %v569_v38 = vpop.f32.mrb[15].mxu0  ;;  %v716_v29 = vpop.f32.mrb[15].mxu1  ;;  %v722_v30 = vadd.f32 %v1266_v49, %v1828_v35 }
 0x1cc   :  { %v570_v31 = vadd.f32 %v569_v38, %v1761_v60  ;;  %v717_v33 = vadd.f32 %v716_v29, %v1828_v35 }
 0x1cd   :  { %v792_v36 = vmul.f32 %v1780_v40, %v568_v25  ;;  %v794_v50 = vmul.f32 %v1836_v48, %v722_v30 }
 0x1ce   :  { %v793_v37 = vmul.f32 %v1786_v47, %v570_v31  ;;  %v791_v42 = vmul.f32 %v1842_v28, %v717_v33 }
 0x1d0   :  { %v826_v44 = vadd.f32 %v793_v37, %v792_v36  ;;  %v1895_v19 = vadd.f32 %v825_v43, %v791_v42 }
 0x1d2   :  { %863 = vrot.lane.b32.xlu0 %v1895_v19, %s1393_s1  ;;  %v1899_v52 = vadd.f32 %v826_v44, %v794_v50 }
 0x1d4   :  { %865 = vrot.lane.b32.xlu1 %v1899_v52, %s1393_s1 }
 0x1d7   :  { %v573_v55 = vpop.f32.mrb[16].mxu0 }
 0x1d8   :  { %v574_v56 = vadd.f32 %v573_v55, %v1758_v51  ;;  %v575_v32 = vpop.f32.mrb[17].mxu0 }
 0x1d9   :  { %v576_v39 = vadd.f32 %v575_v32, %v1761_v60 }
 0x1da   :  { %v795_v57 = vmul.f32 %v1766_v4, %v574_v56 }
 0x1db   :  { %v796_v58 = vmul.f32 %v1772_v0, %v576_v39 }
 0x1dd   :  { %v827_v61 = vadd.f32 %v796_v58, %v795_v57 }
 0x1de   :  { %v579_v62 = vpop.f32.mrb[18].mxu0  ;;  %v1269_v2 = vpop.f32.mrb[16].mxu1 }
 0x1df   :  { %v580_v3 = vadd.f32 %v579_v62, %v1758_v51  ;;  %v581_v5 = vpop.f32.mrb[19].mxu0  ;;  %v726_v6 = vpop.f32.mrb[17].mxu1  ;;  %v732_v7 = vadd.f32 %v1269_v2, %v1828_v35 }
 0x1e0   :  { %v582_v8 = vadd.f32 %v581_v5, %v1761_v60  ;;  %v727_v41 = vadd.f32 %v726_v6, %v1828_v35 }
 0x1e1   :  { %v798_v53 = vmul.f32 %v1780_v40, %v580_v3  ;;  %v800_v14 = vmul.f32 %v1836_v48, %v732_v7  ;;  %v1394_v3 = vmov 0  }
 0x1e2   :  { %v799_v12 = vmul.f32 %v1786_v47, %v582_v8  ;;  %v797_v9 = vmul.f32 %v1842_v28, %v727_v41  ;;  %1340 = vset.pattern.permute.xlu0 %v1394_v3  ;;  %1341 = vset.pattern.permute.xlu1 %v1394_v3 }
 0x1e4   :  { %v828_v15 = vadd.f32 %v799_v12, %v798_v53  ;;  %v1915_v17 = vadd.f32 %v827_v61, %v797_v9 }
 0x1e6   :  { %867 = vrot.lane.b32.xlu0 %v1915_v17, %s1393_s1  ;;  %v1919_v20 = vadd.f32 %v828_v15, %v800_v14 }
 0x1e8   :  { %869 = vrot.lane.b32.xlu1 %v1919_v20, %s1393_s1  ;;  %v585_v21 = vpop.f32.mrb[20].mxu0 }
 0x1e9   :  { %v586_v22 = vadd.f32 %v585_v21, %v1758_v51  ;;  %v587_v23 = vpop.f32.mrb[21].mxu0 }
 0x1ea   :  { %v588_v24 = vadd.f32 %v587_v23, %v1761_v60 }
 0x1eb   :  { %v801_v11 = vmul.f32 %v1766_v4, %v586_v22 }
 0x1ec   :  { %v802_v26 = vmul.f32 %v1772_v0, %v588_v24 }
 0x1ee   :  { %v829_v43 = vadd.f32 %v802_v26, %v801_v11 }
 0x1ef   :  { %v591_v46 = vpop.f32.mrb[22].mxu0  ;;  %v1272_v49 = vpop.f32.mrb[18].mxu1 }
 0x1f0   :  { %v592_v25 = vadd.f32 %v591_v46, %v1758_v51  ;;  %v593_v38 = vpop.f32.mrb[23].mxu0  ;;  %v736_v29 = vpop.f32.mrb[19].mxu1  ;;  %v742_v30 = vadd.f32 %v1272_v49, %v1828_v35  ;;  %v1375_v46 = vld [vmem:[%s2203_s0 + $0x10] sm:$0xff]  ;;  %v1376_v49 = vld [vmem:[%s2203_s0 + $0x20] sm:$0xff] }
 0x1f1   :  { %v594_v31 = vadd.f32 %v593_v38, %v1761_v60  ;;  %v737_v33 = vadd.f32 %v736_v29, %v1828_v35  ;;  %v1378_v38 = vld [vmem:[%s2203_s0 + $0x30] sm:$0xff]  ;;  %v1379_v29 = vld [vmem:[%s2203_s0 + $0x38] sm:$0xff] }
 0x1f2   :  { %v804_v36 = vmul.f32 %v1780_v40, %v592_v25  ;;  %v806_v51 = vmul.f32 %v1836_v48, %v742_v30  ;;  %v1377_v25 = vld [vmem:[%s2203_s0 + $0x28] sm:$0xff]  ;;  %v1380_v30 = vld [vmem:[%s2203_s0 + $0x40] sm:$0xff] }
 0x1f3   :  { %v805_v37 = vmul.f32 %v1786_v47, %v594_v31  ;;  %v803_v4 = vmul.f32 %v1842_v28, %v737_v33  ;;  %v1275_v0 = vpop.f32.mrb[20].mxu1  ;;  %v1381_v31 = vld [vmem:[%s2203_s0 + $0x48] sm:$0xff]  ;;  %v1382_v33 = vld [vmem:[%s2203_s0 + $0x50] sm:$0xff] }
 0x1f4   :  { %v752_v42 = vadd.f32 %v1275_v0, %v1828_v35  ;;  %v746_v50 = vpop.f32.mrb[21].mxu1  ;;  %v1384_v0 = vld [vmem:[%s2203_s0 + $0x68] sm:$0xff] }
 0x1f5   :  { %v830_v44 = vadd.f32 %v805_v37, %v804_v36  ;;  %v747_v55 = vadd.f32 %v746_v50, %v1828_v35  ;;  %v845_v56 = vadd.f32 %v829_v43, %v803_v4  ;;  %v1374_v43 = vld [vmem:[%s2203_s0 + $0x18] sm:$0xff]  ;;  %v1383_v4 = vld [vmem:[%s2203_s0 + $0x60] sm:$0xff] }
 0x1f6   :  { %v812_v60 = vmul.f32 %v1836_v48, %v752_v42 }
 0x1f7   :  { %v809_v32 = vmul.f32 %v1842_v28, %v747_v55  ;;  %v1278_v39 = vpop.f32.mrb[22].mxu1  ;;  %v846_v40 = vadd.f32 %v830_v44, %v806_v51  ;;  %v1386_v51 = vld [vmem:[%s2203_s0 + $0x78] sm:$0xff] }
 0x1f8   :  { %v762_v47 = vadd.f32 %v1278_v39, %v1828_v35  ;;  %v756_v57 = vpop.f32.mrb[23].mxu1  ;;  %v848_v58 = vadd.f32 %v1809_v10, %v812_v60 }
 0x1f9   :  { %v757_v61 = vadd.f32 %v756_v57, %v1828_v35  ;;  %v847_v62 = vadd.f32 %v1800_v63, %v809_v32 }
 0x1fa   :  { %v818_v2 = vmul.f32 %v1836_v48, %v762_v47  ;;  %877 = vrot.lane.b32.xlu1 %v848_v58, %s1393_s1 }
 0x1fb   :  { %v815_v5 = vmul.f32 %v1842_v28, %v757_v61  ;;  %875 = vrot.lane.b32.xlu0 %v847_v62, %s1393_s1 }
 0x1fc   :  { %v850_v6 = vadd.f32 %v1844_v54, %v818_v2 }
 0x1fd   :  { %v849_v7 = vadd.f32 %v1815_v18, %v815_v5 }
 0x1fe   :  { %873 = vrot.lane.b32.xlu1 %v846_v40, %s1393_s1 }
 0x1ff   :  { %871 = vrot.lane.b32.xlu0 %v845_v56, %s1393_s1 }
 0x202   :  { %881 = vrot.lane.b32.xlu1 %v850_v6, %s1393_s1 }
 0x203   :  { %879 = vrot.lane.b32.xlu0 %v849_v7, %s1393_s1 }
 0x206   :  { %853 = vrot.lane.b32.xlu1 %v1851_v59, %s1393_s1 }
 0x207   :  { %851 = vrot.lane.b32.xlu0 %v1855_v1, %s1393_s1 }
 0x235   :  { %v858_v63 = vpop.permute.xlu1 %857 }
 0x236   :  { %v1958_v10 = vadd.f32 %v858_v63, %v1863_v13  ;;  %v856_v35 = vpop.permute.xlu0 %855 }
 0x237   :  { %v1961_v18 = vadd.f32 %v856_v35, %v1867_v16 }
 0x238   :  { %905 = vrot.lane.b32.xlu1 %v1958_v10, %s1395_s23 }
 0x239   :  { %903 = vrot.lane.b32.xlu0 %v1961_v18, %s1395_s23 }
 0x23a   :  { %v862_v48 = vpop.permute.xlu1 %861  ;;  %v860_v28 = vpop.permute.xlu0 %859 }
 0x23b   :  { %v1968_v54 = vadd.f32 %v862_v48, %v1879_v45  ;;  %v1971_v8 = vadd.f32 %v860_v28, %v1881_v27 }
 0x23d   :  { %909 = vrot.lane.b32.xlu1 %v1968_v54, %s1395_s23  ;;  %907 = vrot.lane.b32.xlu0 %v1971_v8, %s1395_s23 }
 0x244   :  { %v864_v13 = vpop.permute.xlu0 %863 }
 0x245   :  { %v1978_v16 = vadd.f32 %v864_v13, %v1895_v19 }
 0x246   :  { %v866_v41 = vpop.permute.xlu1 %865 }
 0x247   :  { %v1981_v53 = vadd.f32 %v866_v41, %v1899_v52  ;;  %911 = vrot.lane.b32.xlu0 %v1978_v16, %s1395_s23  ;;  %v1388_v41 = vld [vmem:[%s2203_s0] sm:$0xff] }
 0x249   :  { %913 = vrot.lane.b32.xlu1 %v1981_v53, %s1395_s23 }
 0x258   :  { %v868_v45 = vpop.permute.xlu0 %867 }
 0x259   :  { %v1988_v27 = vadd.f32 %v868_v45, %v1915_v17 }
 0x25a   :  { %v870_v12 = vpop.permute.xlu1 %869 }
 0x25b   :  { %v1991_v9 = vadd.f32 %v870_v12, %v1919_v20  ;;  %915 = vrot.lane.b32.xlu0 %v1988_v27, %s1395_s23 }
 0x25d   :  { %917 = vrot.lane.b32.xlu1 %v1991_v9, %s1395_s23 }
 0x26c   :  { %v878_v19 = vpop.permute.xlu1 %877 }
 0x26d   :  { %v1997_v52 = vadd.f32 %v878_v19, %v848_v58  ;;  %v876_v14 = vpop.permute.xlu0 %875 }
 0x26e   :  { %v1999_v15 = vadd.f32 %v876_v14, %v847_v62 }
 0x26f   :  { %925 = vrot.lane.b32.xlu1 %v1997_v52, %s1395_s23 }
 0x270   :  { %v874_v17 = vpop.permute.xlu1 %873  ;;  %923 = vrot.lane.b32.xlu0 %v1999_v15, %s1395_s23 }
 0x271   :  { %v2005_v20 = vadd.f32 %v874_v17, %v846_v40  ;;  %v872_v21 = vpop.permute.xlu0 %871 }
 0x272   :  { %v2007_v22 = vadd.f32 %v872_v21, %v845_v56 }
 0x273   :  { %921 = vrot.lane.b32.xlu1 %v2005_v20, %s1395_s23 }
 0x274   :  { %v882_v23 = vpop.permute.xlu1 %881  ;;  %919 = vrot.lane.b32.xlu0 %v2007_v22, %s1395_s23 }
 0x275   :  { %v2013_v24 = vadd.f32 %v882_v23, %v850_v6  ;;  %v880_v11 = vpop.permute.xlu0 %879 }
 0x276   :  { %v2015_v26 = vadd.f32 %v880_v11, %v849_v7 }
 0x277   :  { %929 = vrot.lane.b32.xlu1 %v2013_v24, %s1395_s23 }
 0x278   :  { %927 = vrot.lane.b32.xlu0 %v2015_v26, %s1395_s23  ;;  %v854_v37 = vpop.permute.xlu1 %853 }
 0x279   :  { %v852_v36 = vpop.permute.xlu0 %851  ;;  %v2059_v50 = vadd.f32 %v854_v37, %v1851_v59 }
 0x27a   :  { %v2056_v42 = vadd.f32 %v852_v36, %v1855_v1 }
 0x27b   :  { %960 = vperm.xlu1 %1341, %v1374_v43  }
 0x27c   :  { %956 = vperm.xlu0 %1340, %v1375_v46  }
 0x27f   :  { %964 = vperm.xlu1 %1341, %v1376_v49  }
 0x280   :  { %968 = vperm.xlu0 %1340, %v1377_v25  }
 0x283   :  { %972 = vperm.xlu1 %1341, %v1378_v38  }
 0x284   :  { %976 = vperm.xlu0 %1340, %v1379_v29  }
 0x287   :  { %980 = vperm.xlu1 %1341, %v1380_v30  }
 0x288   :  { %984 = vperm.xlu0 %1340, %v1381_v31  }
 0x28b   :  { %988 = vperm.xlu1 %1341, %v1382_v33  }
 0x28c   :  { %992 = vperm.xlu0 %1340, %v1560_v34   ;;  %v1385_v34 = vld [vmem:[%s2203_s0 + $0x70] sm:$0xff] }
 0x28f   :  { %996 = vperm.xlu1 %1341, %v1383_v4  }
 0x290   :  { %1000 = vperm.xlu0 %1340, %v1384_v0  }
 0x293   :  { %899 = vrot.lane.b32.xlu1 %v2056_v42, %s1395_s23 }
 0x294   :  { %901 = vrot.lane.b32.xlu0 %v2059_v50, %s1395_s23 }
 0x297   :  { %1004 = vperm.xlu1 %1341, %v1385_v34  }
 0x298   :  { %1008 = vperm.xlu0 %1340, %v1386_v51  }
 0x2aa   :  { %v906_v1 = vpop.permute.xlu1 %905 }
 0x2ab   :  { %v2072_v59 = vadd.f32 %v906_v1, %v1958_v10  ;;  %v904_v44 = vpop.permute.xlu0 %903 }
 0x2ac   :  { %v2075_v55 = vadd.f32 %v904_v44, %v1961_v18 }
 0x2ad   :  { %1049 = vrot.lane.b32.xlu0 %v2072_v59, %s1396_s22 }
 0x2ae   :  { %1047 = vrot.lane.b32.xlu1 %v2075_v55, %s1396_s22 }
 0x2af   :  { %v910_v56 = vpop.permute.xlu1 %909  ;;  %v908_v60 = vpop.permute.xlu0 %907 }
 0x2b0   :  { %v2082_v32 = vadd.f32 %v910_v56, %v1968_v54  ;;  %v2085_v39 = vadd.f32 %v908_v60, %v1971_v8 }
 0x2b2   :  { %1053 = vrot.lane.b32.xlu0 %v2082_v32, %s1396_s22  ;;  %1051 = vrot.lane.b32.xlu1 %v2085_v39, %s1396_s22 }
 0x2b9   :  { %v912_v40 = vpop.permute.xlu0 %911 }
 0x2ba   :  { %v2092_v47 = vadd.f32 %v912_v40, %v1978_v16  ;;  %v1387_v16 = vld [vmem:[%s2203_s0 + $0x8] sm:$0xff]  ;;  %s1397_s0 = smov 16  }
 0x2bb   :  { %v914_v57 = vpop.permute.xlu1 %913 }
 0x2bc   :  { %v2095_v58 = vadd.f32 %v914_v57, %v1981_v53  ;;  %1055 = vrot.lane.b32.xlu1 %v2092_v47, %s1396_s22 }
 0x2be   :  { %1057 = vrot.lane.b32.xlu0 %v2095_v58, %s1396_s22 }
 0x2cd   :  { %v916_v61 = vpop.permute.xlu0 %915 }
 0x2ce   :  { %v2102_v62 = vadd.f32 %v916_v61, %v1988_v27 }
 0x2cf   :  { %v918_v2 = vpop.permute.xlu1 %917 }
 0x2d0   :  { %v2105_v3 = vadd.f32 %v918_v2, %v1991_v9  ;;  %1059 = vrot.lane.b32.xlu1 %v2102_v62, %s1396_s22 }
 0x2d2   :  { %1061 = vrot.lane.b32.xlu0 %v2105_v3, %s1396_s22 }
 0x2e1   :  { %v926_v5 = vpop.permute.xlu1 %925 }
 0x2e2   :  { %v944_v6 = vadd.f32 %v926_v5, %v1997_v52  ;;  %v924_v7 = vpop.permute.xlu0 %923 }
 0x2e3   :  { %v943_v63 = vadd.f32 %v924_v7, %v1999_v15 }
 0x2e4   :  { %1069 = vrot.lane.b32.xlu0 %v944_v6, %s1396_s22 }
 0x2e5   :  { %v922_v10 = vpop.permute.xlu1 %921  ;;  %1067 = vrot.lane.b32.xlu1 %v943_v63, %s1396_s22 }
 0x2e6   :  { %v942_v35 = vadd.f32 %v922_v10, %v2005_v20  ;;  %v920_v18 = vpop.permute.xlu0 %919 }
 0x2e7   :  { %v941_v48 = vadd.f32 %v920_v18, %v2007_v22 }
 0x2e8   :  { %1065 = vrot.lane.b32.xlu0 %v942_v35, %s1396_s22 }
 0x2e9   :  { %v930_v28 = vpop.permute.xlu1 %929  ;;  %1063 = vrot.lane.b32.xlu1 %v941_v48, %s1396_s22 }
 0x2ea   :  { %v946_v54 = vadd.f32 %v930_v28, %v2013_v24  ;;  %v928_v8 = vpop.permute.xlu0 %927 }
 0x2eb   :  { %v945_v13 = vadd.f32 %v928_v8, %v2015_v26 }
 0x2ec   :  { %1073 = vrot.lane.b32.xlu0 %v946_v54, %s1396_s22 }
 0x2ed   :  { %1071 = vrot.lane.b32.xlu1 %v945_v13, %s1396_s22 }
 0x2f0   :  { %952 = vperm.xlu0 %1340, %v1387_v16  }
 0x2f1   :  { %948 = vperm.xlu1 %1341, %v1388_v41  }
 0x2fa   :  { %v961_v53 = vpop.permute.xlu1 %960 }
 0x2fb   :  { %v957_v45 = vpop.permute.xlu0 %956  ;;  %v1014_v31 = vmul.f32 %v961_v53, %v2072_v59 }
 0x2fc   :  { %v1013_v33 = vmul.f32 %v957_v45, %v2075_v55 }
 0x2fe   :  { %v965_v27 = vpop.permute.xlu1 %964 }
 0x2ff   :  { %v969_v12 = vpop.permute.xlu0 %968 }
 0x302   :  { %v973_v9 = vpop.permute.xlu1 %972 }
 0x303   :  { %v977_v19 = vpop.permute.xlu0 %976  ;;  %v1017_v59 = vmul.f32 %v973_v9, %v2092_v47 }
 0x304   :  { %v1018_v56 = vmul.f32 %v977_v19, %v2095_v58 }
 0x306   :  { %v981_v52 = vpop.permute.xlu1 %980 }
 0x307   :  { %v985_v14 = vpop.permute.xlu0 %984 }
 0x308   :  { %v1020_v61 = vmul.f32 %v985_v14, %v2105_v3 }
 0x30a   :  { %v989_v15 = vpop.permute.xlu1 %988 }
 0x30b   :  { %v1021_v17 = vmul.f32 %v989_v15, %v941_v48  ;;  %v993_v20 = vpop.permute.xlu0 %992 }
 0x30c   :  { %v1022_v21 = vmul.f32 %v993_v20, %v942_v35 }
 0x30e   :  { %v997_v22 = vpop.permute.xlu1 %996 }
 0x30f   :  { %v1023_v23 = vmul.f32 %v997_v22, %v943_v63  ;;  %v1001_v24 = vpop.permute.xlu0 %1000 }
 0x310   :  { %v1024_v11 = vmul.f32 %v1001_v24, %v944_v6 }
 0x312   :  { %v900_v26 = vpop.permute.xlu1 %899 }
 0x313   :  { %v2130_v43 = vadd.f32 %v900_v26, %v2056_v42  ;;  %v902_v46 = vpop.permute.xlu0 %901  ;;  %v1015_v42 = vmul.f32 %v965_v27, %v2085_v39 }
 0x314   :  { %v2133_v49 = vadd.f32 %v902_v46, %v2059_v50  ;;  %v1016_v50 = vmul.f32 %v969_v12, %v2082_v32  ;;  %v1019_v32 = vmul.f32 %v981_v52, %v2102_v62 }
 0x315   :  { %1043 = vrot.lane.b32.xlu1 %v2130_v43, %s1396_s22 }
 0x316   :  { %v1005_v25 = vpop.permute.xlu1 %1004  ;;  %1045 = vrot.lane.b32.xlu0 %v2133_v49, %s1396_s22 }
 0x317   :  { %v1025_v38 = vmul.f32 %v1005_v25, %v945_v13  ;;  %v1009_v29 = vpop.permute.xlu0 %1008 }
 0x318   :  { %v1026_v30 = vmul.f32 %v1009_v29, %v946_v54 }
 0x31f   :  { %v1050_v36 = vpop.permute.xlu0 %1049 }
 0x320   :  { %v1094_v37 = vadd.f32 %v1050_v36, %v1014_v31  ;;  %v1048_v4 = vpop.permute.xlu1 %1047 }
 0x321   :  { %v1093_v0 = vadd.f32 %v1048_v4, %v1013_v33 }
 0x322   :  { %1114 = vrot.lane.b32.xlu0 %v1094_v37, %s1397_s0 }
 0x323   :  { %1112 = vrot.lane.b32.xlu1 %v1093_v0, %s1397_s0 }
 0x324   :  { %v1052_v34 = vpop.permute.xlu1 %1051  ;;  %v1054_v51 = vpop.permute.xlu0 %1053 }
 0x325   :  { %v1095_v1 = vadd.f32 %v1052_v34, %v1015_v42  ;;  %v1096_v44 = vadd.f32 %v1054_v51, %v1016_v50 }
 0x327   :  { %1123 = vrot.lane.b32.xlu1 %v1095_v1, %s1395_s23  ;;  %1125 = vrot.lane.b32.xlu0 %v1096_v44, %s1395_s23  ;;  %s1399_s23 = smov 96  }
 0x32e   :  { %v1056_v55 = vpop.permute.xlu1 %1055 }
 0x32f   :  { %v1097_v60 = vadd.f32 %v1056_v55, %v1017_v59 }
 0x330   :  { %v1058_v40 = vpop.permute.xlu0 %1057 }
 0x331   :  { %v1098_v57 = vadd.f32 %v1058_v40, %v1018_v56  ;;  %1134 = vrot.lane.b32.xlu1 %v1097_v60, %s1398_s28 }
 0x333   :  { %1136 = vrot.lane.b32.xlu0 %v1098_v57, %s1398_s28 }
 0x342   :  { %v1060_v39 = vpop.permute.xlu1 %1059 }
 0x343   :  { %v1099_v2 = vadd.f32 %v1060_v39, %v1019_v32 }
 0x344   :  { %v1062_v5 = vpop.permute.xlu0 %1061 }
 0x345   :  { %v1100_v6 = vadd.f32 %v1062_v5, %v1020_v61  ;;  %1145 = vrot.lane.b32.xlu1 %v1099_v2, %s1393_s1 }
 0x347   :  { %1147 = vrot.lane.b32.xlu0 %v1100_v6, %s1393_s1 }
 0x356   :  { %v1070_v47 = vpop.permute.xlu0 %1069 }
 0x357   :  { %v1104_v58 = vadd.f32 %v1070_v47, %v1024_v11  ;;  %v1068_v7 = vpop.permute.xlu1 %1067 }
 0x358   :  { %v1103_v63 = vadd.f32 %v1068_v7, %v1023_v23 }
 0x359   :  { %1169 = vrot.lane.b32.xlu0 %v1104_v58, %s1399_s23 }
 0x35a   :  { %1167 = vrot.lane.b32.xlu1 %v1103_v63, %s1399_s23  ;;  %v1066_v10 = vpop.permute.xlu0 %1065 }
 0x35b   :  { %v1102_v35 = vadd.f32 %v1066_v10, %v1022_v21  ;;  %v1064_v62 = vpop.permute.xlu1 %1063 }
 0x35c   :  { %v1101_v18 = vadd.f32 %v1064_v62, %v1021_v17 }
 0x35d   :  { %1158 = vrot.lane.b32.xlu0 %v1102_v35, %s1400_s29 }
 0x35e   :  { %1156 = vrot.lane.b32.xlu1 %v1101_v18, %s1400_s29  ;;  %v1074_v3 = vpop.permute.xlu0 %1073 }
 0x35f   :  { %v1106_v48 = vadd.f32 %v1074_v3, %v1026_v30  ;;  %v1072_v28 = vpop.permute.xlu1 %1071 }
 0x360   :  { %v1105_v54 = vadd.f32 %v1072_v28, %v1025_v38 }
 0x361   :  { %1180 = vrot.lane.b32.xlu0 %v1106_v48, %s1396_s22 }
 0x362   :  { %1178 = vrot.lane.b32.xlu1 %v1105_v54, %s1396_s22 }
 0x36f   :  { %v953_v13 = vpop.permute.xlu0 %952 }
 0x370   :  { %v949_v8 = vpop.permute.xlu1 %948  ;;  %v1012_v41 = vmul.f32 %v953_v13, %v2133_v49 }
 0x371   :  { %v1011_v16 = vmul.f32 %v949_v8, %v2130_v43 }
 0x387   :  { %v1044_v53 = vpop.permute.xlu1 %1043 }
 0x388   :  { %v1091_v45 = vadd.f32 %v1044_v53, %v1011_v16  ;;  %v1046_v27 = vpop.permute.xlu0 %1045 }
 0x389   :  { %v1092_v12 = vadd.f32 %v1046_v27, %v1012_v41 }
 0x38a   :  { %1108 = vst.msk [vmem:[%s2209_s6] sm:$0xff] %vm1107_vm1, %v1091_v45 }
 0x38b   :  { %1109 = vst.msk [vmem:[%s2209_s6 + $0x8] sm:$0xff] %vm1107_vm1, %v1092_v12 }
 0x394   :  { %v1115_v9 = vpop.permute.xlu0 %1114 }
 0x395   :  { %1120 = vst.msk [vmem:[%s2209_s6 + $0x8] sm:$0xff] %vm1118_vm2, %v1115_v9  ;;  %v1113_v19 = vpop.permute.xlu1 %1112 }
 0x396   :  { %1119 = vst.msk [vmem:[%s2209_s6] sm:$0xff] %vm1118_vm2, %v1113_v19 }
 0x399   :  { %v1124_v52 = vpop.permute.xlu1 %1123  ;;  %v1126_v14 = vpop.permute.xlu0 %1125 }
 0x39a   :  { %1130 = vst.msk [vmem:[%s2209_s6] sm:$0xff] %vm1129_vm3, %v1124_v52  ;;  %1131 = vst.msk [vmem:[%s2209_s6 + $0x8] sm:$0xff] %vm1129_vm3, %v1126_v14 }
 0x3a3   :  { %v1135_v15 = vpop.permute.xlu1 %1134 }
 0x3a4   :  { %1141 = vst.msk [vmem:[%s2209_s6] sm:$0xff] %vm1140_vm4, %v1135_v15 }
 0x3a5   :  { %v1137_v17 = vpop.permute.xlu0 %1136 }
 0x3a6   :  { %1142 = vst.msk [vmem:[%s2209_s6 + $0x8] sm:$0xff] %vm1140_vm4, %v1137_v17 }
 0x3b7   :  { %v1146_v20 = vpop.permute.xlu1 %1145 }
 0x3b8   :  { %1152 = vst.msk [vmem:[%s2209_s6] sm:$0xff] %vm1151_vm5, %v1146_v20 }
 0x3b9   :  { %v1148_v21 = vpop.permute.xlu0 %1147 }
 0x3ba   :  { %1153 = vst.msk [vmem:[%s2209_s6 + $0x8] sm:$0xff] %vm1151_vm5, %v1148_v21 }
 0x3cb   :  { %v1170_v22 = vpop.permute.xlu0 %1169 }
 0x3cc   :  { %v1168_v23 = vpop.permute.xlu1 %1167 }
 0x3cf   :  { %v1159_v24 = vpop.permute.xlu0 %1158 }
 0x3d0   :  { %1164 = vst.msk [vmem:[%s2209_s6 + $0x8] sm:$0xff] %vm1162_vm6, %v1159_v24  ;;  %v1157_v11 = vpop.permute.xlu1 %1156 }
 0x3d1   :  { %1163 = vst.msk [vmem:[%s2209_s6] sm:$0xff] %vm1162_vm6, %v1157_v11 }
 0x3d2   :  { %1175 = vst.msk [vmem:[%s2209_s6 + $0x8] sm:$0xff] %vm1173_vm7, %v1170_v22  ;;  %1174 = vst.msk [vmem:[%s2209_s6] sm:$0xff] %vm1173_vm7, %v1168_v23 }
 0x3d3   :  { %v1181_v26 = vpop.permute.xlu0 %1180 }
 0x3d4   :  { %1186 = vst.msk [vmem:[%s2209_s6 + $0x8] sm:$0xff] %vm1184_vm8, %v1181_v26  ;;  %v1179_v43 = vpop.permute.xlu1 %1178 }
 0x3d5   :  { %1185 = vst.msk [vmem:[%s2209_s6] sm:$0xff] %vm1184_vm8, %v1179_v43 }

</bundles_post_ra>
